<compile_context>
chip_gen: v7x
topology: tpu7x:2x2x1
jax: 0.10.0
libtpu: 0.0.40
codegen_flags: <defaults>
</compile_context>

<pallas_src>
import functools

import jax
import jax.numpy as jnp
from jax import lax
from jax.experimental import pallas as pl
from jax.experimental.pallas import tpu as pltpu


# ---------------------------------------------------------------------------
# Kernel 1: fused QKV projection -> head-major q, k, v  (q pre-scaled, bf16)
# ---------------------------------------------------------------------------
def qkv_proj_kernel(x_ref, wq_ref, wk_ref, wv_ref, q_ref, k_ref, v_ref, *,
                    num_heads, scale):
    tr, C = x_ref.shape
    H = num_heads
    hd = C // H
    x = x_ref[...].astype(jnp.bfloat16)               # bf16 MXU operands
    q = jnp.dot(x, wq_ref[...], preferred_element_type=jnp.float32) * scale
    k = jnp.dot(x, wk_ref[...], preferred_element_type=jnp.float32)
    v = jnp.dot(x, wv_ref[...], preferred_element_type=jnp.float32)
    # head-major (H, tr, hd) layout feeding the attention kernel
    q_ref[...] = q.reshape(tr, H, hd).transpose(1, 0, 2).astype(q_ref.dtype)
    k_ref[...] = k.reshape(tr, H, hd).transpose(1, 0, 2).astype(k_ref.dtype)
    v_ref[...] = v.reshape(tr, H, hd).transpose(1, 0, 2).astype(v_ref.dtype)


# ---------------------------------------------------------------------------
# Kernel 2: flash-style attention + fused output projection
# ---------------------------------------------------------------------------
def flash_attn_proj_kernel(q_ref, k_ref, v_ref, wp_ref, bp_ref, o_ref,
                           m_ref, l_ref, acc_ref, *, tkv, n_valid, needs_mask):
    kv = pl.program_id(2)

    @pl.when(kv == 0)
    def _init():
        m_ref[...] = jnp.full(m_ref.shape, -jnp.inf, m_ref.dtype)
        l_ref[...] = jnp.zeros(l_ref.shape, l_ref.dtype)
        acc_ref[...] = jnp.zeros(acc_ref.shape, acc_ref.dtype)

    q = q_ref[...]                        # (H, tq,  hd) bf16, scale folded in
    k = k_ref[...]                        # (H, tkv, hd) bf16
    v = v_ref[...]                        # (H, tkv, hd) bf16

    s = jnp.einsum('hqd,hkd->hqk', q, k,
                   preferred_element_type=jnp.float32)   # (H, tq, tkv) f32

    m_prev = m_ref[...]                                  # (H, tq)
    m_new = jnp.maximum(m_prev, jnp.max(s, axis=-1))
    alpha = jnp.exp(m_prev - m_new)                      # (H, tq)
    p = jnp.exp(s - m_new[..., None])                    # (H, tq, tkv)
    if needs_mask:
        key_idx = kv * tkv + lax.broadcasted_iota(jnp.int32, (1, 1, tkv), 2)
        p = jnp.where(key_idx < n_valid, p, 0.0)         # zero padded keys

    l_ref[...] = alpha * l_ref[...] + jnp.sum(p, axis=-1)
    acc_ref[...] = alpha[..., None] * acc_ref[...] + jnp.einsum(
        'hqk,hkd->hqd', p.astype(v.dtype), v,
        preferred_element_type=jnp.float32)
    m_ref[...] = m_new

    @pl.when(kv == pl.num_programs(2) - 1)
    def _finalize():
        H, tq, hd = acc_ref.shape
        C = o_ref.shape[-1]
        # Deferred normalization: reciprocal (EUP) scales (H, tq, hd), not
        # the (H, tq, N) probabilities.
        inv_l = pl.reciprocal(l_ref[...], approx=True)
        o = (acc_ref[...] * inv_l[..., None]).astype(wp_ref.dtype)
        # Output projection as H accumulating MXU calls: no merge-heads
        # lane relayout (Wproj pre-reshaped to (H, hd, C) on the host).
        y = jnp.zeros((tq, C), jnp.float32)
        for h in range(H):
            y = y + jnp.dot(o[h], wp_ref[h],
                            preferred_element_type=jnp.float32)
        o_ref[...] = (y + bp_ref[...]).astype(o_ref.dtype)


# ---------------------------------------------------------------------------
# Host-side helpers
# ---------------------------------------------------------------------------
def _round_up(x, m):
    return (x + m - 1) // m * m


def _cdiv(a, b):
    return -(-a // b)


def _tpu_vmem_capacity():
    try:
        return int(pltpu.get_tpu_info().vmem_capacity_bytes)
    except Exception:
        return 64 * 1024 * 1024           # conservative: v7x per-TC VMEM


def _choose_tiles(N, C, num_heads):
    """Pick (tq, tkv, padded_N, attn_vmem_estimate, vmem_capacity)."""
    H = num_heads
    hd = C // H
    # Query tile: ~256 rows (MXU-friendly M), multiple of 8, minimal padding.
    nq = max(1, _cdiv(N, 256))
    tq = _round_up(_cdiv(N, nq), 8)
    n_pad = nq * tq

    cap = _tpu_vmem_capacity()
    budget = int(cap * 0.80)

    def attn_vmem(tkv):
        bf, f32 = 2, 4
        q_blk = 2 * H * tq * hd * bf                    # double-buffered
        kv_blk = 2 * 2 * H * tkv * hd * bf
        w_blk = C * C * bf + C * f32                    # single-buffered wp/bias
        o_blk = 2 * tq * C * f32
        scratch = H * tq * hd * f32 + 2 * H * tq * f32
        scores = int(2.5 * H * tq * tkv * f32)          # s/p/exp temporaries
        return q_blk + kv_blk + w_blk + o_blk + scratch + scores + (2 << 20)

    # KV tile: largest n_pad // nkv (nkv | nq) whose live set fits the budget.
    tkv = tq
    for nkv in range(1, nq + 1):
        if nq % nkv:
            continue
        cand = n_pad // nkv
        if attn_vmem(cand) <= budget:
            tkv = cand
            break
    return tq, tkv, n_pad, attn_vmem(tkv), cap


def _weight_spec(shape, index_map, single_buffer):
    # Grid-invariant blocks: request a single VMEM buffer instead of the
    # default double buffering.
    if single_buffer:
        return pl.BlockSpec(shape, index_map, pipeline_mode=pl.Buffered(1))
    return pl.BlockSpec(shape, index_map)


def _wave_attention_impl(x, wqkv, wproj, bproj, *, num_heads,
                         single_buffer_weights):
    B, N, C = x.shape
    assert C % num_heads == 0
    H = num_heads
    hd = C // H
    scale = float(hd ** -0.5)

    tq, tkv, n_pad, attn_est, cap = _choose_tiles(N, C, H)
    nq = n_pad // tq
    nkv = n_pad // tkv
    needs_mask = n_pad != N

    # Host-side weight prep: lane-aligned splits, bf16 MXU operands.
    wq = wqkv[:, :C].astype(jnp.bfloat16)
    wk = wqkv[:, C:2 * C].astype(jnp.bfloat16)
    wv = wqkv[:, 2 * C:].astype(jnp.bfloat16)
    wp3 = wproj.reshape(H, hd, C).astype(jnp.bfloat16)
    bp = bproj.reshape(1, C).astype(jnp.float32)

    xp = x if n_pad == N else jnp.pad(x, ((0, 0), (0, n_pad - N), (0, 0)))

    # ---------------------------------------------------------------- QKV
    wbuf = 1 if single_buffer_weights else 2
    qkv_vmem = (2 * tq * C * 4 + wbuf * 3 * C * C * 2
                + 2 * 3 * tq * C * 2 + 6 * tq * C * 4 + (2 << 20))
    qkv_vmem = min(max(qkv_vmem, 32 << 20), int(cap * 0.9))

    kernel1 = functools.partial(qkv_proj_kernel, num_heads=H, scale=scale)
    head_shape = jax.ShapeDtypeStruct((B, H, n_pad, hd), jnp.bfloat16)
    q_hm, k_hm, v_hm = pl.pallas_call(
        kernel1,
        out_shape=(head_shape, head_shape, head_shape),
        grid=(B, nq),
        in_specs=[
            pl.BlockSpec((None, tq, C), lambda b, r: (b, r, 0)),
            _weight_spec((C, C), lambda b, r: (0, 0), single_buffer_weights),
            _weight_spec((C, C), lambda b, r: (0, 0), single_buffer_weights),
            _weight_spec((C, C), lambda b, r: (0, 0), single_buffer_weights),
        ],
        out_specs=(
            pl.BlockSpec((None, H, tq, hd), lambda b, r: (b, 0, r, 0)),
            pl.BlockSpec((None, H, tq, hd), lambda b, r: (b, 0, r, 0)),
            pl.BlockSpec((None, H, tq, hd), lambda b, r: (b, 0, r, 0)),
        ),
        compiler_params=pltpu.CompilerParams(
            dimension_semantics=("parallel", "parallel"),
            vmem_limit_bytes=qkv_vmem),
    )(xp, wq, wk, wv)

    # ----------------------------------------------- attention + out proj
    attn_vmem = min(max(attn_est + (8 << 20), 32 << 20), int(cap * 0.9))
    kernel2 = functools.partial(flash_attn_proj_kernel,
                                tkv=tkv, n_valid=N, needs_mask=needs_mask)

    y = pl.pallas_call(
        kernel2,
        out_shape=jax.ShapeDtypeStruct((B, n_pad, C), x.dtype),
        grid=(B, nq, nkv),
        in_specs=[
            pl.BlockSpec((None, H, tq, hd), lambda b, qi, kv: (b, 0, qi, 0)),
            pl.BlockSpec((None, H, tkv, hd), lambda b, qi, kv: (b, 0, kv, 0)),
            pl.BlockSpec((None, H, tkv, hd), lambda b, qi, kv: (b, 0, kv, 0)),
            _weight_spec((H, hd, C), lambda b, qi, kv: (0, 0, 0),
                         single_buffer_weights),
            _weight_spec((1, C), lambda b, qi, kv: (0, 0),
                         single_buffer_weights),
        ],
        out_specs=pl.BlockSpec((None, tq, C), lambda b, qi, kv: (b, qi, 0)),
        scratch_shapes=[
            pltpu.VMEM((H, tq), jnp.float32),       # running max
            pltpu.VMEM((H, tq), jnp.float32),       # running denominator
            pltpu.VMEM((H, tq, hd), jnp.float32),   # running PV accumulator
        ],
        compiler_params=pltpu.CompilerParams(
            dimension_semantics=("parallel", "parallel", "arbitrary"),
            vmem_limit_bytes=attn_vmem),
    )(q_hm, k_hm, v_hm, wp3, bp)

    return y if n_pad == N else y[:, :N, :]


def wave_attention(x, wqkv, wproj, bproj, *, num_heads):
    try:
        y = _wave_attention_impl(x, wqkv, wproj, bproj, num_heads=num_heads,
                                 single_buffer_weights=True)
        return jax.block_until_ready(y)
    except Exception:
        # pl.Buffered(1) single-buffering unavailable on this JAX build:
        # retry with default double-buffered weight blocks.
        return _wave_attention_impl(x, wqkv, wproj, bproj,
                                    num_heads=num_heads,
                                    single_buffer_weights=False)


def reference(x, wqkv, wproj, bproj, *, num_heads):
    """Pure-JAX (f32) mirror of the PyTorch forward for verification."""
    B, N, C = x.shape
    hd = C // num_heads
    scale = hd ** -0.5
    qkv = (x @ wqkv).reshape(B, N, 3, num_heads, hd).transpose(2, 0, 3, 1, 4)
    q, k, v = qkv[0], qkv[1], qkv[2]                       # (B, H, N, hd)
    attn = (q @ jnp.swapaxes(k, -2, -1)) * scale
    attn = jax.nn.softmax(attn, axis=-1)
    out = (attn @ v).transpose(0, 2, 1, 3).reshape(B, N, C)
    return out @ wproj + bproj


if __name__ == "__main__":
    # Small shapes consistent with the module: dim divisible by num_heads=8.
    B, N, C = 2, 8, 32
    num_heads = 8

    key = jax.random.PRNGKey(0)
    kx, kqkv, kproj, kb = jax.random.split(key, 4)

    x = jax.random.normal(kx, (B, N, C), dtype=jnp.float32)
    wqkv = jax.random.normal(kqkv, (C, 3 * C), dtype=jnp.float32) * 0.05
    wproj = jax.random.normal(kproj, (C, C), dtype=jnp.float32) * 0.05
    bproj = jax.random.normal(kb, (C,), dtype=jnp.float32) * 0.05

    # TODO(synk): DWT_1D/IDWT_1D are constructed but never used in forward();
    # attn_drop/proj_drop are p=0.0 -> identity. Both intentionally omitted.
    y = wave_attention(x, wqkv, wproj, bproj, num_heads=num_heads)
    y = jax.block_until_ready(y)

    y_ref = reference(x, wqkv, wproj, bproj, num_heads=num_heads)
    # Tolerance covers bf16 MXU operands (f32 accumulation) and the EUP
    # approximate reciprocal in the softmax normalization.
    assert jnp.allclose(y, y_ref, atol=1e-2, rtol=1e-2), "mismatch vs reference"

    print("KERNEL_OK")
</pallas_src>

<mosaic_0001>
module attributes {stable_mosaic.version = 11 : i64} {
  func.func @qkv_proj_kernel(%arg0: i32, %arg1: i32, %arg2: memref<1x8x32xf32, #tpu.memory_space<vmem>>, %arg3: memref<32x32xbf16, #tpu.memory_space<vmem>>, %arg4: memref<32x32xbf16, #tpu.memory_space<vmem>>, %arg5: memref<32x32xbf16, #tpu.memory_space<vmem>>, %arg6: memref<1x8x8x4xbf16, #tpu.memory_space<vmem>>, %arg7: memref<1x8x8x4xbf16, #tpu.memory_space<vmem>>, %arg8: memref<1x8x8x4xbf16, #tpu.memory_space<vmem>>) attributes {dimension_semantics = [#tpu.dimension_semantics<parallel>, #tpu.dimension_semantics<parallel>], iteration_bounds = array<i64: 2, 1>, scalar_prefetch = 0 : i64, scratch_operands = 0 : i64, tpu.core_type = #tpu.core_type<tc>, window_params = [{transform_indices = @transform_0, window_bounds = array<i64: 1, 8, 32>}, {pipeline_mode = #tpu.pipeline_mode<synchronous>, transform_indices = @transform_1, window_bounds = array<i64: 32, 32>}, {pipeline_mode = #tpu.pipeline_mode<synchronous>, transform_indices = @transform_2, window_bounds = array<i64: 32, 32>}, {pipeline_mode = #tpu.pipeline_mode<synchronous>, transform_indices = @transform_3, window_bounds = array<i64: 32, 32>}, {transform_indices = @transform_4, window_bounds = array<i64: 1, 8, 8, 4>}, {transform_indices = @transform_5, window_bounds = array<i64: 1, 8, 8, 4>}, {transform_indices = @transform_6, window_bounds = array<i64: 1, 8, 8, 4>}]} {
    %c0 = arith.constant 0 : index
    %c0_0 = arith.constant 0 : index
    %c0_1 = arith.constant 0 : index
    %0 = vector.load %arg2[%c0, %c0_0, %c0_1] : memref<1x8x32xf32, #tpu.memory_space<vmem>>, vector<1x8x32xf32>
    %1 = vector.shape_cast %0 : vector<1x8x32xf32> to vector<8x32xf32>
    %2 = arith.truncf %1 : vector<8x32xf32> to vector<8x32xbf16>
    %c0_2 = arith.constant 0 : index
    %c0_3 = arith.constant 0 : index
    %3 = vector.load %arg3[%c0_2, %c0_3] : memref<32x32xbf16, #tpu.memory_space<vmem>>, vector<32x32xbf16>
    %cst = arith.constant dense<0.000000e+00> : vector<8x32xf32>
    %4 = tpu.matmul %2, %3, %cst {dimension_numbers = #tpu.dot_dimension_numbers<[1], [0], [0], [1], [0, 0, 1, 1], [], []>} : vector<8x32xbf16>, vector<32x32xbf16>, vector<8x32xf32> -> vector<8x32xf32>
    %cst_4 = arith.constant 5.000000e-01 : f32
    %5 = vector.broadcast %cst_4 : f32 to vector<8x32xf32>
    %6 = arith.mulf %4, %5 : vector<8x32xf32>
    %c0_5 = arith.constant 0 : index
    %c0_6 = arith.constant 0 : index
    %7 = vector.load %arg4[%c0_5, %c0_6] : memref<32x32xbf16, #tpu.memory_space<vmem>>, vector<32x32xbf16>
    %cst_7 = arith.constant dense<0.000000e+00> : vector<8x32xf32>
    %8 = tpu.matmul %2, %7, %cst_7 {dimension_numbers = #tpu.dot_dimension_numbers<[1], [0], [0], [1], [0, 0, 1, 1], [], []>} : vector<8x32xbf16>, vector<32x32xbf16>, vector<8x32xf32> -> vector<8x32xf32>
    %c0_8 = arith.constant 0 : index
    %c0_9 = arith.constant 0 : index
    %9 = vector.load %arg5[%c0_8, %c0_9] : memref<32x32xbf16, #tpu.memory_space<vmem>>, vector<32x32xbf16>
    %cst_10 = arith.constant dense<0.000000e+00> : vector<8x32xf32>
    %10 = tpu.matmul %2, %9, %cst_10 {dimension_numbers = #tpu.dot_dimension_numbers<[1], [0], [0], [1], [0, 0, 1, 1], [], []>} : vector<8x32xbf16>, vector<32x32xbf16>, vector<8x32xf32> -> vector<8x32xf32>
    %11 = vector.shape_cast %6 : vector<8x32xf32> to vector<8x8x4xf32>
    %12 = tpu.transpose %11, [1, 0, 2] : vector<8x8x4xf32> -> vector<8x8x4xf32>
    %13 = arith.truncf %12 : vector<8x8x4xf32> to vector<8x8x4xbf16>
    %c0_11 = arith.constant 0 : index
    %c0_12 = arith.constant 0 : index
    %c0_13 = arith.constant 0 : index
    %c0_14 = arith.constant 0 : index
    %14 = vector.load %arg6[%c0_11, %c0_12, %c0_13, %c0_14] : memref<1x8x8x4xbf16, #tpu.memory_space<vmem>>, vector<1x8x8x4xbf16>
    %15 = vector.shape_cast %14 : vector<1x8x8x4xbf16> to vector<8x8x4xbf16>
    %16 = vector.shape_cast %13 : vector<8x8x4xbf16> to vector<1x8x8x4xbf16>
    tpu.vector_store %arg6[%c0_11, %c0_12, %c0_13, %c0_14], %16 {strides = array<i32>} : memref<1x8x8x4xbf16, #tpu.memory_space<vmem>>, vector<1x8x8x4xbf16>,
    %17 = vector.shape_cast %8 : vector<8x32xf32> to vector<8x8x4xf32>
    %18 = tpu.transpose %17, [1, 0, 2] : vector<8x8x4xf32> -> vector<8x8x4xf32>
    %19 = arith.truncf %18 : vector<8x8x4xf32> to vector<8x8x4xbf16>
    %c0_15 = arith.constant 0 : index
    %c0_16 = arith.constant 0 : index
    %c0_17 = arith.constant 0 : index
    %c0_18 = arith.constant 0 : index
    %20 = vector.load %arg7[%c0_15, %c0_16, %c0_17, %c0_18] : memref<1x8x8x4xbf16, #tpu.memory_space<vmem>>, vector<1x8x8x4xbf16>
    %21 = vector.shape_cast %20 : vector<1x8x8x4xbf16> to vector<8x8x4xbf16>
    %22 = vector.shape_cast %19 : vector<8x8x4xbf16> to vector<1x8x8x4xbf16>
    tpu.vector_store %arg7[%c0_15, %c0_16, %c0_17, %c0_18], %22 {strides = array<i32>} : memref<1x8x8x4xbf16, #tpu.memory_space<vmem>>, vector<1x8x8x4xbf16>,
    %23 = vector.shape_cast %10 : vector<8x32xf32> to vector<8x8x4xf32>
    %24 = tpu.transpose %23, [1, 0, 2] : vector<8x8x4xf32> -> vector<8x8x4xf32>
    %25 = arith.truncf %24 : vector<8x8x4xf32> to vector<8x8x4xbf16>
    %c0_19 = arith.constant 0 : index
    %c0_20 = arith.constant 0 : index
    %c0_21 = arith.constant 0 : index
    %c0_22 = arith.constant 0 : index
    %26 = vector.load %arg8[%c0_19, %c0_20, %c0_21, %c0_22] : memref<1x8x8x4xbf16, #tpu.memory_space<vmem>>, vector<1x8x8x4xbf16>
    %27 = vector.shape_cast %26 : vector<1x8x8x4xbf16> to vector<8x8x4xbf16>
    %28 = vector.shape_cast %25 : vector<8x8x4xbf16> to vector<1x8x8x4xbf16>
    tpu.vector_store %arg8[%c0_19, %c0_20, %c0_21, %c0_22], %28 {strides = array<i32>} : memref<1x8x8x4xbf16, #tpu.memory_space<vmem>>, vector<1x8x8x4xbf16>,
    return
  }
  func.func @transform_0(%arg0: i32, %arg1: i32) -> (i32, i32, i32) {
    %c0_i32 = arith.constant 0 : i32
    %c0_i32_0 = arith.constant 0 : i32
    return %arg0, %arg1, %c0_i32 : i32, i32, i32
  }
  func.func @transform_1(%arg0: i32, %arg1: i32) -> (i32, i32) {
    %c0_i32 = arith.constant 0 : i32
    %c0_i32_0 = arith.constant 0 : i32
    %c0_i32_1 = arith.constant 0 : i32
    return %c0_i32, %c0_i32_0 : i32, i32
  }
  func.func @transform_2(%arg0: i32, %arg1: i32) -> (i32, i32) {
    %c0_i32 = arith.constant 0 : i32
    %c0_i32_0 = arith.constant 0 : i32
    %c0_i32_1 = arith.constant 0 : i32
    return %c0_i32, %c0_i32_0 : i32, i32
  }
  func.func @transform_3(%arg0: i32, %arg1: i32) -> (i32, i32) {
    %c0_i32 = arith.constant 0 : i32
    %c0_i32_0 = arith.constant 0 : i32
    %c0_i32_1 = arith.constant 0 : i32
    return %c0_i32, %c0_i32_0 : i32, i32
  }
  func.func @transform_4(%arg0: i32, %arg1: i32) -> (i32, i32, i32, i32) {
    %c0_i32 = arith.constant 0 : i32
    %c0_i32_0 = arith.constant 0 : i32
    %c0_i32_1 = arith.constant 0 : i32
    return %arg0, %c0_i32, %arg1, %c0_i32_0 : i32, i32, i32, i32
  }
  func.func @transform_5(%arg0: i32, %arg1: i32) -> (i32, i32, i32, i32) {
    %c0_i32 = arith.constant 0 : i32
    %c0_i32_0 = arith.constant 0 : i32
    %c0_i32_1 = arith.constant 0 : i32
    return %arg0, %c0_i32, %arg1, %c0_i32_0 : i32, i32, i32, i32
  }
  func.func @transform_6(%arg0: i32, %arg1: i32) -> (i32, i32, i32, i32) {
    %c0_i32 = arith.constant 0 : i32
    %c0_i32_0 = arith.constant 0 : i32
    %c0_i32_1 = arith.constant 0 : i32
    return %arg0, %c0_i32, %arg1, %c0_i32_0 : i32, i32, i32, i32
  }
}

module attributes {stable_mosaic.version = 11 : i64} {
  func.func @qkv_proj_kernel(%arg0: i32, %arg1: i32, %arg2: memref<1x8x32xf32, #tpu.memory_space<vmem>>, %arg3: memref<32x32xbf16, #tpu.memory_space<vmem>>, %arg4: memref<32x32xbf16, #tpu.memory_space<vmem>>, %arg5: memref<32x32xbf16, #tpu.memory_space<vmem>>, %arg6: memref<1x8x8x4xbf16, #tpu.memory_space<vmem>>, %arg7: memref<1x8x8x4xbf16, #tpu.memory_space<vmem>>, %arg8: memref<1x8x8x4xbf16, #tpu.memory_space<vmem>>) attributes {dimension_semantics = [#tpu.dimension_semantics<parallel>, #tpu.dimension_semantics<parallel>], iteration_bounds = array<i64: 2, 1>, scalar_prefetch = 0 : i64, scratch_operands = 0 : i64, tpu.core_type = #tpu.core_type<tc>, window_params = [{transform_indices = @transform_0, window_bounds = array<i64: 1, 8, 32>}, {pipeline_mode = #tpu.pipeline_mode<synchronous>, transform_indices = @transform_1, window_bounds = array<i64: 32, 32>}, {pipeline_mode = #tpu.pipeline_mode<synchronous>, transform_indices = @transform_2, window_bounds = array<i64: 32, 32>}, {pipeline_mode = #tpu.pipeline_mode<synchronous>, transform_indices = @transform_3, window_bounds = array<i64: 32, 32>}, {transform_indices = @transform_4, window_bounds = array<i64: 1, 8, 8, 4>}, {transform_indices = @transform_5, window_bounds = array<i64: 1, 8, 8, 4>}, {transform_indices = @transform_6, window_bounds = array<i64: 1, 8, 8, 4>}]} {
    %c0 = arith.constant 0 : index
    %c0_0 = arith.constant 0 : index
    %c0_1 = arith.constant 0 : index
    %0 = vector.load %arg2[%c0, %c0_0, %c0_1] : memref<1x8x32xf32, #tpu.memory_space<vmem>>, vector<1x8x32xf32>
    %1 = vector.shape_cast %0 : vector<1x8x32xf32> to vector<8x32xf32>
    %2 = arith.truncf %1 : vector<8x32xf32> to vector<8x32xbf16>
    %c0_2 = arith.constant 0 : index
    %c0_3 = arith.constant 0 : index
    %3 = vector.load %arg3[%c0_2, %c0_3] : memref<32x32xbf16, #tpu.memory_space<vmem>>, vector<32x32xbf16>
    %cst = arith.constant dense<0.000000e+00> : vector<8x32xf32>
    %4 = tpu.matmul %2, %3, %cst {dimension_numbers = #tpu.dot_dimension_numbers<[1], [0], [0], [1], [0, 0, 1, 1], [], []>} : vector<8x32xbf16>, vector<32x32xbf16>, vector<8x32xf32> -> vector<8x32xf32>
    %cst_4 = arith.constant 5.000000e-01 : f32
    %5 = vector.broadcast %cst_4 : f32 to vector<8x32xf32>
    %6 = arith.mulf %4, %5 : vector<8x32xf32>
    %c0_5 = arith.constant 0 : index
    %c0_6 = arith.constant 0 : index
    %7 = vector.load %arg4[%c0_5, %c0_6] : memref<32x32xbf16, #tpu.memory_space<vmem>>, vector<32x32xbf16>
    %cst_7 = arith.constant dense<0.000000e+00> : vector<8x32xf32>
    %8 = tpu.matmul %2, %7, %cst_7 {dimension_numbers = #tpu.dot_dimension_numbers<[1], [0], [0], [1], [0, 0, 1, 1], [], []>} : vector<8x32xbf16>, vector<32x32xbf16>, vector<8x32xf32> -> vector<8x32xf32>
    %c0_8 = arith.constant 0 : index
    %c0_9 = arith.constant 0 : index
    %9 = vector.load %arg5[%c0_8, %c0_9] : memref<32x32xbf16, #tpu.memory_space<vmem>>, vector<32x32xbf16>
    %cst_10 = arith.constant dense<0.000000e+00> : vector<8x32xf32>
    %10 = tpu.matmul %2, %9, %cst_10 {dimension_numbers = #tpu.dot_dimension_numbers<[1], [0], [0], [1], [0, 0, 1, 1], [], []>} : vector<8x32xbf16>, vector<32x32xbf16>, vector<8x32xf32> -> vector<8x32xf32>
    %11 = vector.shape_cast %6 : vector<8x32xf32> to vector<8x8x4xf32>
    %12 = tpu.transpose %11, [1, 0, 2] : vector<8x8x4xf32> -> vector<8x8x4xf32>
    %13 = arith.truncf %12 : vector<8x8x4xf32> to vector<8x8x4xbf16>
    %c0_11 = arith.constant 0 : index
    %c0_12 = arith.constant 0 : index
    %c0_13 = arith.constant 0 : index
    %c0_14 = arith.constant 0 : index
    %14 = vector.load %arg6[%c0_11, %c0_12, %c0_13, %c0_14] : memref<1x8x8x4xbf16, #tpu.memory_space<vmem>>, vector<1x8x8x4xbf16>
    %15 = vector.shape_cast %14 : vector<1x8x8x4xbf16> to vector<8x8x4xbf16>
    %16 = vector.shape_cast %13 : vector<8x8x4xbf16> to vector<1x8x8x4xbf16>
    tpu.vector_store %arg6[%c0_11, %c0_12, %c0_13, %c0_14], %16 {strides = array<i32>} : memref<1x8x8x4xbf16, #tpu.memory_space<vmem>>, vector<1x8x8x4xbf16>,
    %17 = vector.shape_cast %8 : vector<8x32xf32> to vector<8x8x4xf32>
    %18 = tpu.transpose %17, [1, 0, 2] : vector<8x8x4xf32> -> vector<8x8x4xf32>
    %19 = arith.truncf %18 : vector<8x8x4xf32> to vector<8x8x4xbf16>
    %c0_15 = arith.constant 0 : index
    %c0_16 = arith.constant 0 : index
    %c0_17 = arith.constant 0 : index
    %c0_18 = arith.constant 0 : index
    %20 = vector.load %arg7[%c0_15, %c0_16, %c0_17, %c0_18] : memref<1x8x8x4xbf16, #tpu.memory_space<vmem>>, vector<1x8x8x4xbf16>
    %21 = vector.shape_cast %20 : vector<1x8x8x4xbf16> to vector<8x8x4xbf16>
    %22 = vector.shape_cast %19 : vector<8x8x4xbf16> to vector<1x8x8x4xbf16>
    tpu.vector_store %arg7[%c0_15, %c0_16, %c0_17, %c0_18], %22 {strides = array<i32>} : memref<1x8x8x4xbf16, #tpu.memory_space<vmem>>, vector<1x8x8x4xbf16>,
    %23 = vector.shape_cast %10 : vector<8x32xf32> to vector<8x8x4xf32>
    %24 = tpu.transpose %23, [1, 0, 2] : vector<8x8x4xf32> -> vector<8x8x4xf32>
    %25 = arith.truncf %24 : vector<8x8x4xf32> to vector<8x8x4xbf16>
    %c0_19 = arith.constant 0 : index
    %c0_20 = arith.constant 0 : index
    %c0_21 = arith.constant 0 : index
    %c0_22 = arith.constant 0 : index
    %26 = vector.load %arg8[%c0_19, %c0_20, %c0_21, %c0_22] : memref<1x8x8x4xbf16, #tpu.memory_space<vmem>>, vector<1x8x8x4xbf16>
    %27 = vector.shape_cast %26 : vector<1x8x8x4xbf16> to vector<8x8x4xbf16>
    %28 = vector.shape_cast %25 : vector<8x8x4xbf16> to vector<1x8x8x4xbf16>
    tpu.vector_store %arg8[%c0_19, %c0_20, %c0_21, %c0_22], %28 {strides = array<i32>} : memref<1x8x8x4xbf16, #tpu.memory_space<vmem>>, vector<1x8x8x4xbf16>,
    return
  }
  func.func @transform_0(%arg0: i32, %arg1: i32) -> (i32, i32, i32) {
    %c0_i32 = arith.constant 0 : i32
    %c0_i32_0 = arith.constant 0 : i32
    return %arg0, %arg1, %c0_i32 : i32, i32, i32
  }
  func.func @transform_1(%arg0: i32, %arg1: i32) -> (i32, i32) {
    %c0_i32 = arith.constant 0 : i32
    %c0_i32_0 = arith.constant 0 : i32
    %c0_i32_1 = arith.constant 0 : i32
    return %c0_i32, %c0_i32_0 : i32, i32
  }
  func.func @transform_2(%arg0: i32, %arg1: i32) -> (i32, i32) {
    %c0_i32 = arith.constant 0 : i32
    %c0_i32_0 = arith.constant 0 : i32
    %c0_i32_1 = arith.constant 0 : i32
    return %c0_i32, %c0_i32_0 : i32, i32
  }
  func.func @transform_3(%arg0: i32, %arg1: i32) -> (i32, i32) {
    %c0_i32 = arith.constant 0 : i32
    %c0_i32_0 = arith.constant 0 : i32
    %c0_i32_1 = arith.constant 0 : i32
    return %c0_i32, %c0_i32_0 : i32, i32
  }
  func.func @transform_4(%arg0: i32, %arg1: i32) -> (i32, i32, i32, i32) {
    %c0_i32 = arith.constant 0 : i32
    %c0_i32_0 = arith.constant 0 : i32
    %c0_i32_1 = arith.constant 0 : i32
    return %arg0, %c0_i32, %arg1, %c0_i32_0 : i32, i32, i32, i32
  }
  func.func @transform_5(%arg0: i32, %arg1: i32) -> (i32, i32, i32, i32) {
    %c0_i32 = arith.constant 0 : i32
    %c0_i32_0 = arith.constant 0 : i32
    %c0_i32_1 = arith.constant 0 : i32
    return %arg0, %c0_i32, %arg1, %c0_i32_0 : i32, i32, i32, i32
  }
  func.func @transform_6(%arg0: i32, %arg1: i32) -> (i32, i32, i32, i32) {
    %c0_i32 = arith.constant 0 : i32
    %c0_i32_0 = arith.constant 0 : i32
    %c0_i32_1 = arith.constant 0 : i32
    return %arg0, %c0_i32, %arg1, %c0_i32_0 : i32, i32, i32, i32
  }
}

</mosaic_0001>

<bundles_post_ra>
// kernel: tpu_custom_call.1
= control target key start
LH: loop header
LB: loop body
LE: loop exit
PB: predicated region body
PF: predicated region fallthrough
CT: control target
= control target key end

     0   :  { %12 = vsyncpa [#allocation3], 0  ;;  %s2558_s0 = inlined_call_operand.hbm [shape: f32[2,8,32], index: 0, kind: input, shape index: {}]   ;;  %s2559_s1 = inlined_call_operand.hbm [shape: bf16[32,32], index: 1, kind: input, shape index: {}]   ;;  %s2560_s2 = inlined_call_operand.hbm [shape: bf16[32,32], index: 2, kind: input, shape index: {}]   ;;  %s2561_s3 = inlined_call_operand.hbm [shape: bf16[32,32], index: 3, kind: input, shape index: {}]   ;;  %s2562_s4 = inlined_call_operand.vmem [shape: bf16[2,8,8,4], index: 4, kind: output, shape index: {0}]   ;;  %s2563_s5 = inlined_call_operand.vmem [shape: bf16[2,8,8,4], index: 5, kind: output, shape index: {1}]   ;;  %s2564_s6 = inlined_call_operand.vmem [shape: bf16[2,8,8,4], index: 6, kind: output, shape index: {2}]  }
   0x1   :  { %14 = vsyncpa [#allocation3 + $0x1], 0 }
   0x2   :  { %15 = vsyncpa [#allocation5], 0 }
   0x3   :  { %16 = vsyncpa [#allocation8], 0  ;;  %s2119_s21 = smov 0   ;;  %s2121_s22 = smov 0  }
   0x4   :  { %s2123_s23 = smov 0   ;;  %s2125_s24 = smov 0  }
   0x5   :  { %s2127_s25 = smov 0   ;;  %s2129_s26 = smov 0  }
   0x6 LB: > { %s1697_s27 = sadd.s32 4294967295, %s2065_s26   ;;  %p56_p0 = scmp.ne.s32.totalorder %s2049_s22, %s2045_s21  ;;  %s2065_s26 = sphi %s2129_s26, %s22_s26   ;;  %s2061_s25 = sphi %s2127_s25, %s2583_s25   ;;  %s2057_s24 = sphi %s2125_s24, %s2582_s24   ;;  %s2053_s23 = sphi %s2123_s23, %s2581_s23   ;;  %s2049_s22 = sphi %s2121_s22, %s2580_s22   ;;  %s2045_s21 = sphi %s2119_s21, %s2579_s21  }
   0x7   : > { %p2149_p1 = scmp.eq.s32.totalorder %s1697_s27, 0  ;;  %p1699_p2 = scmp.ge.s32.totalorder %s2065_s26, 1 }
   0x8   : > { %p214_p3 = scmp.lt.s32.totalorder %s2065_s26, 3  ;;  %s2067_s7 = smov [#allocation4]  }
   0x9   : > { %s2569_s28 = scalar_select %p2149_p1, 1, 0 }
   0xa   : > { %p2157_p4 = por %p2149_p1, %p56_p0  ;;  %p2161_p5 = pnand %p1699_p2, %p214_p3 }
   0xb   : > { %s226_s8 = sshll.u32 %s2067_s7, 4  ;;  %s2068_s10 = smov [#allocation6]   ;;  %s2165_s8 = int_to_ptr.vmem [resolvable:$true] %s226_s8 }
   0xc   : > { %s2570_s29 = scalar_select %p2157_p4, 1, 0 }
   0xd   : > { %s2571_s30 = scalar_select %p2161_p5, 1, 0 }
   0xe   : > { %p1802_p6 = pneg %p2161_p5  ;;  %s239_s11 = sshll.u32 %s2068_s10, 4  ;;  %s2175_s11 = int_to_ptr.vmem [resolvable:$true] %s239_s11 }
   0xf   : > { %s2069_s12 = smov [#allocation7]   ;;  %s1893_s16 = scalar_lea.hbm %s2559_s1, 256 }
  0x10   : > { %p2171_p7 = pnand %p1802_p6, %p2149_p1  ;;  %s2177_s13 = sshll.u32 %s2069_s12, 4  ;;  %s253_s13 = int_to_ptr.vmem [resolvable:$true] %s2177_s13 }
  0x11   : > { %p1894_p8 = scmp.ne.s32.totalorder %s2559_s1, %s1893_s16  ;;  %p1900_p12 = scmp.lt.u32.totalorder %s1893_s16, %s2559_s1 }
  0x12   : > { %p2187_p9 = pneg %p2171_p7 }
  0x14   : > { %p1896_p10 = pnand %p2187_p9, %p1894_p8 }
  0x16   : > { %p1897_p11 = pneg %p1896_p10 }
  0x18   : > { %p1902_p13 = pnand %p1900_p12, %p1897_p11 }
  0x1a   : > { %1905 = shalt.err (!%p1902_p13)
}
  0x1b   : > { %s1906_s27 = scalar_lea.vmem %s2165_s8, 256  ;;  %p1914_p6 = scmp.lt.s32.totalorder %s2165_s8, %s2165_s8 }
  0x1c   : > { %p1907_p0 = scmp.ne.s32.totalorder %s2165_s8, %s1906_s27  ;;  %p1915_p1 = scmp.lt.s32.totalorder %s1906_s27, %s1906_s27 }
  0x1e   : > { %p1909_p2 = pnand %p1907_p0, %p2187_p9  ;;  %p1916_p8 = por %p1915_p1, %p1914_p6 }
  0x20   : > { %p1910_p3 = pneg %p1909_p2 }
  0x22   : > { %p1917_p10 = pnand %p1916_p8, %p1910_p3 }
  0x24   : > { %1920 = shalt.err (!%p1917_p10)
}
  0x25   : > { %s2070_s7 = smov 64   ;;  %s2071_s10 = smov 4  }
  0x26   : > { %1805 = dma.hbm_to_vmem [thread:$0]  (!%p2171_p7), %s2559_s1, 256, %s2165_s8, [#allocation5], %s2070_s7, %s2070_s7, %s2071_s10  }
  0x27   : > { %s1921_s17 = scalar_lea.hbm %s2560_s2, 256 }
  0x28   : > { %p1922_p1 = scmp.ne.s32.totalorder %s2560_s2, %s1921_s17  ;;  %p1928_p13 = scmp.lt.u32.totalorder %s1921_s17, %s2560_s2 }
  0x2a   : > { %p1924_p11 = pnand %p1922_p1, %p2187_p9 }
  0x2c   : > { %p1925_p12 = pneg %p1924_p11 }
  0x2e   : > { %p1930_p0 = pnand %p1928_p13, %p1925_p12 }
  0x30   : > { %1933 = shalt.err (!%p1930_p0)
}
  0x31   : > { %s1934_s8 = scalar_lea.vmem %s2175_s11, 256  ;;  %p1942_p8 = scmp.lt.s32.totalorder %s2175_s11, %s2175_s11 }
  0x32   : > { %p1935_p2 = scmp.ne.s32.totalorder %s2175_s11, %s1934_s8  ;;  %p1943_p10 = scmp.lt.s32.totalorder %s1934_s8, %s1934_s8 }
  0x34   : > { %p1937_p3 = pnand %p1935_p2, %p2187_p9  ;;  %p1944_p1 = por %p1943_p10, %p1942_p8 }
  0x36   : > { %p1938_p6 = pneg %p1937_p3 }
  0x38   : > { %p1945_p11 = pnand %p1944_p1, %p1938_p6 }
  0x3a   : > { %1948 = shalt.err (!%p1945_p11)
}
  0x3b   : > { %1808 = dma.hbm_to_vmem [thread:$0]  (!%p2171_p7), %s2560_s2, 256, %s2175_s11, [#allocation5], %s2070_s7, %s2070_s7, %s2071_s10  }
  0x3c   : > { %s1949_s17 = scalar_lea.hbm %s2561_s3, 256 }
  0x3d   : > { %p1950_p12 = scmp.ne.s32.totalorder %s2561_s3, %s1949_s17  ;;  %p1956_p2 = scmp.lt.u32.totalorder %s1949_s17, %s2561_s3 }
  0x3f   : > { %p1952_p13 = pnand %p1950_p12, %p2187_p9 }
  0x41   : > { %p1953_p0 = pneg %p1952_p13 }
  0x43   : > { %p1958_p3 = pnand %p1956_p2, %p1953_p0 }
  0x45   : > { %1961 = shalt.err (!%p1958_p3)
}
  0x46   : > { %s1962_s8 = scalar_lea.vmem %s253_s13, 256  ;;  %p1970_p1 = scmp.lt.s32.totalorder %s253_s13, %s253_s13 }
  0x47   : > { %p1963_p6 = scmp.ne.s32.totalorder %s253_s13, %s1962_s8  ;;  %p1971_p11 = scmp.lt.s32.totalorder %s1962_s8, %s1962_s8 }
  0x49   : > { %p1965_p8 = pnand %p1963_p6, %p2187_p9  ;;  %p1972_p4 = por %p1971_p11, %p1970_p1 }
  0x4b   : > { %p1966_p10 = pneg %p1965_p8 }
  0x4d   : > { %p1973_p5 = pnand %p1972_p4, %p1966_p10 }
  0x4f   : > { %1976 = shalt.err (!%p1973_p5)
}
  0x50   : > { %1811 = dma.hbm_to_vmem [thread:$0]  (!%p2171_p7), %s2561_s3, 256, %s253_s13, [#allocation8], %s2070_s7, %s2070_s7, %s2071_s10  }
  0x51   : > { %s34_s19 = sadd.s32 1, %s2061_s25  ;;  %p50_p4 = scmp.ne.s32.totalorder %s2053_s23, %s2049_s22 }
  0x52   : > { %p36_p5 = scmp.ge.s32.totalorder %s34_s19, 2  ;;  %p51_p9 = scmp.eq.s32.totalorder %s2065_s26, 0 }
  0x53   : > { %s43_s9 = sadd.s32 1, %s2053_s23  ;;  %s266_s14 = sand.u32 1, %s2053_s23  }
  0x54   : > { %s2585_s19 = smov (%p36_p5, %s34_s19), 0  ;;  %p52_p12 = por %p51_p9, %p50_p4 }
  0x55   : > { %p1819_p13 = scmp.lt.s32.totalorder %s2065_s26, 2  ;;  %s38_s15 = ssub.s32 %s2061_s25, %s2585_s19 }
  0x56   : > { %s1704_s16 = sshll.u32 %s266_s14, 3  ;;  %p41_p0 = scmp.eq.s32.totalorder %s38_s15, 0 }
  0x57   : > { %s1705_s17 = sshll.u32 %s2061_s25, 7  ;;  %s270_s18 = scalar_lea.vmem [#allocation2], %s1704_s16 }
  0x58   : > { %s278_s20 = sshll.u32 %s270_s18, 4  ;;  %s2277_s10 = scalar_lea.hbm %s2558_s0, %s1705_s17  ;;  %s2279_s20 = int_to_ptr.vmem [resolvable:$true] %s278_s20 }
  0x59   : > { %s2272_s21 = scalar_select %p41_p0, %s2053_s23, %s43_s9  }
  0x5a   : > { %p2281_p7 = pnand %p1819_p13, %p52_p12  ;;  %s267_s8 = scalar_lea.sflag [#allocation3], %s266_s14 }
  0x5b   : > { %s1977_s11 = scalar_lea.hbm %s2277_s10, 128  ;;  %s1982_s15 = scalar_lea.hbm %s2558_s0, 256 }
  0x5c   : > { %p1978_p2 = scmp.ne.s32.totalorder %s2277_s10, %s1977_s11  ;;  %p1979_p3 = pneg %p2281_p7 }
  0x5d   : > { %p1983_p10 = scmp.lt.u32.totalorder %s2277_s10, %s2558_s0  ;;  %p1984_p1 = scmp.lt.u32.totalorder %s1982_s15, %s1977_s11 }
  0x5e   : > { %p1980_p6 = pnand %p1979_p3, %p1978_p2  ;;  %p1986_p4 = scmp.lt.u32.totalorder %s1977_s11, %s2277_s10 }
  0x5f   : > { %p1985_p11 = por %p1984_p1, %p1983_p10 }
  0x60   : > { %p1981_p8 = pneg %p1980_p6 }
  0x61   : > { %p1987_p5 = por %p1986_p4, %p1985_p11 }
  0x63   : > { %p1988_p9 = pnand %p1987_p5, %p1981_p8 }
  0x65   : > { %1991 = shalt.err (!%p1988_p9)
}
  0x66   : > { %s1992_s14 = scalar_lea.vmem %s2279_s20, 128  ;;  %s2072_s18 = smov [#allocation2]  }
  0x67   : > { %p1993_p12 = scmp.ne.s32.totalorder %s2279_s20, %s1992_s14  ;;  %s1997_s13 = sshll.u32 %s2072_s18, 4  ;;  %s1998_s13 = int_to_ptr.vmem [resolvable:$false] %s1997_s13 }
  0x68   : > { %s1999_s7 = scalar_lea.vmem %s1998_s13, 256  ;;  %p2000_p2 = scmp.lt.s32.totalorder %s2279_s20, %s1998_s13 }
  0x69   : > { %p1995_p13 = pnand %p1993_p12, %p1979_p3  ;;  %p2001_p6 = scmp.lt.s32.totalorder %s1999_s7, %s1992_s14 }
  0x6b   : > { %p1996_p0 = pneg %p1995_p13  ;;  %p2002_p10 = por %p2001_p6, %p2000_p2 }
  0x6d   : > { %p2003_p1 = pnand %p2002_p10, %p1996_p0 }
  0x6f   : > { %2006 = shalt.err (!%p2003_p1)
}
  0x70   : > { %1815 = dma.hbm_to_vmem [thread:$0]  (!%p2281_p7), %s2277_s10, 128, %s2279_s20, %s267_s8  }
  0x71   : > { %p2575_p8 = scmp.ne.s32.totalorder %s2571_s30, 0 }
  0x72   : > { %s289_s11 = sand.u32 (!%p2575_p8), 1, %s2049_s22   ;;  %p2576_p3 = scmp.ne.s32.totalorder (!%p2575_p8), %s2570_s29, 0 }
  0x73   : > { %287 = sbr.rel (%p2575_p8) target bundleno = 542 (0x21e), region = 36  ;;  %s1707_s12 = sshll.u32 (!%p2575_p8), %s289_s11, 3 }
  0x74   : > { %s290_s9 = scalar_lea.sflag (!%p2575_p8), [#allocation3], %s289_s11  ;;  %s293_s15 = scalar_lea.vmem (!%p2575_p8), [#allocation2], %s1707_s12 }
  0x7a   : > { %2032 = dma.done.wait (%p2576_p3), %s290_s9, 128  }
  0x7b   : > { %2034 = vsyncadd (%p2576_p3), %s290_s9, 4294967168  ;;  %p2577_p11 = scmp.ne.s32.totalorder %s2569_s28, 0 }
  0x7d   : > { %2036 = dma.done.wait (%p2577_p11), [#allocation5], 512  }
  0x7e   : > { %2038 = vsyncadd (%p2577_p11), [#allocation5], 4294966784 }
  0x7f   : > { %2040 = dma.done.wait (%p2577_p11), [#allocation8], 256  }
  0x80   : > { %2042 = vsyncadd (%p2577_p11), [#allocation8], 4294967040  ;;  %v2073_v0 = vmov 0.0   ;;  %vm2074_vm0 = vmmov 0   ;;  %v1887_v1 = vld [vmem:[#allocation6] sm:$0xff]   ;;  %v1888_v2 = vld [vmem:[#allocation6 + $0x8] sm:$0xff]   ;;  %v580_v24 = vlaneseq }
  0x81   : > { %1772 = vmatprep.subr.bf16.mxu1 %v2073_v0  ;;  %1764 = vmatprep.subr.bf16.mxu0 %v2073_v0  ;;  %v1889_v3 = vld [vmem:[#allocation4] sm:$0xff]   ;;  %v378_v4 = vld [vmem:[%s293_s15] sm:$0xff]  ;;  %v1890_v5 = vld [vmem:[#allocation4 + $0x8] sm:$0xff]   ;;  %vm396_vm1 = vcmask 261120   ;;  %s2075_s28 = smov 120   ;;  %s2076_s29 = smov 124  }
  0x82   : > { %1776 = vmatprep.mubr.msk.bf16.mxu1 %vm2074_vm0, %v2073_v0  ;;  %1768 = vmatprep.mubr.msk.bf16.mxu0 %vm2074_vm0, %v2073_v0  ;;  %v379_v6 = vpack.c.bf16 %v378_v4, %v378_v4  ;;  %v1891_v7 = vld [vmem:[#allocation7] sm:$0xff]   ;;  %v1892_v8 = vld [vmem:[#allocation7 + $0x8] sm:$0xff]   ;;  %s2077_s30 = smov 112   ;;  %s2078_s20 = smov 116   ;;  %v2082_v22 = vmov 1983009808  }
  0x83   : > { %1773 = vmatpush3.bf16.msra.mxu1 %v1887_v1  ;;  %1765 = vmatpush3.bf16.msra.mxu0 %v1889_v3  ;;  %s2079_s10 = smov 104   ;;  %s2080_s27 = smov 108   ;;  %v578_v23 = vunpack.c.l.s4 %v2082_v22  ;;  %v2083_v25 = vmov 1934713408   ;;  %v581_v28 = vshrl.u32 %v580_v24, 7  ;;  %vm855_vm2 = vcmask 27648  }
  0x84   : > { %1774 = vmatprep.subr.bf16.mxu1 %v2073_v0  ;;  %1766 = vmatprep.subr.bf16.mxu0 %v2073_v0  ;;  %s2081_s8 = smov 100   ;;  %v642_v26 = vunpack.c.l.s4 %v2083_v25  ;;  %p353_p7 = scmp.lt.s32.totalorder %s2057_s24, 1 }
  0x85   : > { %v579_v27 = vunpack.c.0.s8 %v578_v23 }
  0x86   : > { %v643_v31 = vunpack.c.0.s8 %v642_v26  ;;  %s2587_s24 = smov (!%p353_p7, %s2057_s24), 1 }
  0x87   : > { %1775 = vmatpush3.bf16.msra.mxu1 %v1888_v2  ;;  %1767 = vmatpush3.bf16.msra.mxu0 %v1890_v5  ;;  %v2352_v32 = vsub.s32 %v579_v27, %v581_v28  ;;  %s2378_s16 = sshll.u32 %s2587_s24, 5 }
  0x88   : > { %1780 = vmatprep.subr.bf16.mxu0 %v2073_v0  ;;  %v2354_v39 = vsub.s32 %v643_v31, %v581_v28  ;;  %s2394_s14 = scalar_lea.vmem %s2563_s5, %s2378_s16  ;;  %s2456_s7 = scalar_lea.vmem %s2562_s4, %s2378_s16 }
  0x89   : > { %s2514_s9 = scalar_lea.vmem %s2564_s6, %s2378_s16 }
  0x8a   : > { %1777 = vmatmul.mubr.msk.bf16.vlgmr.msra.gmra.mrb[0].mxu1 %vm396_vm1, %v379_v6  ;;  %1769 = vmatmul.mubr.msk.bf16.vlgmr.msra.gmra.mrb[0].mxu0 %vm396_vm1, %v379_v6 }
  0x8b   : > { %1781 = vmatpush3.bf16.msra.mxu0 %v1891_v7  ;;  %1784 = vmatprep.mubr.msk.bf16.mxu0 %vm2074_vm0, %v2073_v0 }
  0x8c   : > { %1782 = vmatprep.subr.bf16.mxu0 %v2073_v0 }
  0x8f   : > { %1783 = vmatpush3.bf16.msra.mxu0 %v1892_v8 }
  0x92   : > { %1785 = vmatmul.mubr.msk.bf16.vlgmr.msra.gmra.mrb[4].mxu0 %vm396_vm1, %v379_v6 }
 0x15d   : > { %v491_v9 = vpop.f32.mrb[0].mxu1  ;;  %v434_v12 = vpop.f32.mrb[0].mxu0 }
 0x15e   : > { %868 = vrot.lane.b32.xlu0 %v491_v9, %s2075_s28  ;;  %865 = vrot.lane.b32.xlu1 %v491_v9, %s2076_s29  ;;  %v1778_v10 = vpop.f32.mrb[1].mxu1  ;;  %v1770_v14 = vpop.f32.mrb[1].mxu0  ;;  %v2330_v17 = vmul.f32 0.5, %v434_v12 }
 0x15f   : > { %v494_v11 = vpop.f32.mrb[2].mxu1  ;;  %v437_v15 = vpop.f32.mrb[2].mxu0 }
 0x160   : > { %v1779_v13 = vpop.f32.mrb[3].mxu1  ;;  %v1771_v16 = vpop.f32.mrb[3].mxu0 }
 0x162   : > { %874 = vrot.lane.b32.xlu0 %v491_v9, %s2077_s30  ;;  %871 = vrot.lane.b32.xlu1 %v491_v9, %s2078_s20 }
 0x165   : > { %v2332_v18 = vpop.f32.mrb[4].mxu0 }
 0x166   : > { %880 = vrot.lane.b32.xlu0 %v491_v9, %s2079_s10  ;;  %877 = vrot.lane.b32.xlu1 %v491_v9, %s2080_s27  ;;  %v1786_v19 = vpop.f32.mrb[5].mxu0 }
 0x167   : > { %v550_v20 = vpop.f32.mrb[6].mxu0 }
 0x168   : > { %v1787_v21 = vpop.f32.mrb[7].mxu0 }
 0x16a   : > { %883 = vrot.lane.b32.xlu1 %v491_v9, %s2081_s8  ;;  %554 = vrot.lane.b32.xlu0 %v2330_v17, %s2076_s29 }
 0x16e   : > { %560 = vrot.lane.b32.xlu1 %v2330_v17, %s2078_s20  ;;  %557 = vrot.lane.b32.xlu0 %v2330_v17, %s2075_s28 }
 0x172   : > { %563 = vrot.lane.b32.xlu1 %v2330_v17, %s2077_s30  ;;  %566 = vrot.lane.b32.xlu0 %v2330_v17, %s2080_s27 }
 0x176   : > { %569 = vrot.lane.b32.xlu1 %v2330_v17, %s2079_s10  ;;  %572 = vrot.lane.b32.xlu0 %v2330_v17, %s2081_s8 }
 0x17a   : > { %1178 = vrot.lane.b32.xlu1 %v2332_v18, %s2075_s28  ;;  %1175 = vrot.lane.b32.xlu0 %v2332_v18, %s2076_s29 }
 0x17e   : > { %1184 = vrot.lane.b32.xlu1 %v2332_v18, %s2077_s30  ;;  %1181 = vrot.lane.b32.xlu0 %v2332_v18, %s2078_s20 }
 0x182   : > { %1190 = vrot.lane.b32.xlu1 %v2332_v18, %s2079_s10  ;;  %1187 = vrot.lane.b32.xlu0 %v2332_v18, %s2080_s27 }
 0x186   : > { %1193 = vrot.lane.b32.xlu0 %v2332_v18, %s2081_s8 }
 0x1d0   : > { %v869_v29 = vpop.permute.xlu0 %868  ;;  %v866_v30 = vpop.permute.xlu1 %865 }
 0x1d1   : > { %v886_v33 = vcombine.low %v491_v9, %v869_v29  ;;  %v887_v34 = vcombine.high %v491_v9, %v869_v29 }
 0x1d3   : > { %v894_v40 = vrot.slane %v886_v33, %v2352_v32  ;;  %v901_v41 = vrot.slane %v887_v34, %v2352_v32 }
 0x1d4   : > { %v875_v35 = vpop.permute.xlu0 %874  ;;  %v872_v36 = vpop.permute.xlu1 %871 }
 0x1d5   : > { %v902_v37 = vcombine.low %v866_v30, %v872_v36  ;;  %v903_v38 = vcombine.high %v866_v30, %v872_v36 }
 0x1d7   : > { %v910_v42 = vrot.slane %v902_v37, %v2352_v32  ;;  %v917_v43 = vrot.slane %v903_v38, %v2352_v32 }
 0x1d8   : > { %v881_v44 = vpop.permute.xlu0 %880  ;;  %v878_v45 = vpop.permute.xlu1 %877 }
 0x1d9   : > { %v950_v46 = vcombine.low %v894_v40, %v910_v42  ;;  %v951_v47 = vcombine.high %v894_v40, %v910_v42  ;;  %v966_v48 = vcombine.low %v901_v41, %v917_v43  ;;  %v967_v49 = vcombine.high %v901_v41, %v917_v43 }
 0x1da   : > { %v918_v54 = vcombine.low %v875_v35, %v881_v44  ;;  %v919_v55 = vcombine.high %v875_v35, %v881_v44 }
 0x1db   : > { %v958_v50 = vrot.slane %v950_v46, %v2354_v39  ;;  %v965_v51 = vrot.slane %v951_v47, %v2354_v39  ;;  %v974_v52 = vrot.slane %v966_v48, %v2354_v39  ;;  %v981_v53 = vrot.slane %v967_v49, %v2354_v39 }
 0x1dc   : > { %v884_v56 = vpop.permute.xlu1 %883  ;;  %v2365_v57 = vpop.permute.xlu0 %554  ;;  %v926_v4 = vrot.slane %v918_v54, %v2352_v32  ;;  %v933_v5 = vrot.slane %v919_v55, %v2352_v32 }
 0x1dd   : > { %v1734_v58 = vcombine.low %v958_v50, %v965_v51  ;;  %v1736_v59 = vcombine.high %v958_v50, %v965_v51  ;;  %v1738_v60 = vcombine.low %v974_v52, %v981_v53  ;;  %v1740_v61 = vcombine.high %v974_v52, %v981_v53 }
 0x1de   : > { %v934_v62 = vcombine.low %v878_v45, %v884_v56  ;;  %v935_v63 = vcombine.high %v878_v45, %v884_v56 }
 0x1df   : > { %v1030_v0 = vrot.slane %v1734_v58, %v2352_v32  ;;  %v1046_v1 = vrot.slane %v1736_v59, %v2352_v32  ;;  %v1062_v2 = vrot.slane %v1738_v60, %v2352_v32  ;;  %v1078_v3 = vrot.slane %v1740_v61, %v2352_v32 }
 0x1e0   : > { %v942_v6 = vrot.slane %v934_v62, %v2352_v32  ;;  %v949_v7 = vrot.slane %v935_v63, %v2352_v32  ;;  %v558_v8 = vpop.permute.xlu0 %557  ;;  %v561_v23 = vpop.permute.xlu1 %560 }
 0x1e1   : > { %v1086_v9 = vcombine.low %v1030_v0, %v1046_v1  ;;  %v1087_v10 = vcombine.high %v1030_v0, %v1046_v1  ;;  %v1118_v11 = vcombine.low %v1062_v2, %v1078_v3  ;;  %v1119_v12 = vcombine.high %v1062_v2, %v1078_v3 }
 0x1e2   : > { %v982_v13 = vcombine.low %v926_v4, %v942_v6  ;;  %v983_v14 = vcombine.high %v926_v4, %v942_v6  ;;  %v998_v15 = vcombine.low %v933_v5, %v949_v7  ;;  %v999_v16 = vcombine.high %v933_v5, %v949_v7 }
 0x1e3   : > { %v1094_v19 = vrot.slane %v1086_v9, %v2354_v39  ;;  %v1101_v20 = vrot.slane %v1087_v10, %v2354_v39  ;;  %v1126_v21 = vrot.slane %v1118_v11, %v2354_v39  ;;  %v1133_v22 = vrot.slane %v1119_v12, %v2354_v39 }
 0x1e4   : > { %v990_v24 = vrot.slane %v982_v13, %v2354_v39  ;;  %v997_v25 = vrot.slane %v983_v14, %v2354_v39  ;;  %v1006_v26 = vrot.slane %v998_v15, %v2354_v39  ;;  %v1013_v27 = vrot.slane %v999_v16, %v2354_v39  ;;  %v2388_v33 = vpop.permute.xlu0 %566  ;;  %v564_v51 = vpop.permute.xlu1 %563 }
 0x1e5   : > { %v1150_v28 = vcombine.low %v1094_v19, %v1126_v21  ;;  %v1151_v29 = vcombine.high %v1094_v19, %v1126_v21  ;;  %v1152_v30 = vcombine.low %v1101_v20, %v1133_v22  ;;  %v1153_v31 = vcombine.high %v1101_v20, %v1133_v22 }
 0x1e6   : > { %v1735_v34 = vcombine.low %v990_v24, %v997_v25  ;;  %v1737_v35 = vcombine.high %v990_v24, %v997_v25  ;;  %v1739_v36 = vcombine.low %v1006_v26, %v1013_v27  ;;  %v1741_v37 = vcombine.high %v1006_v26, %v1013_v27 }
 0x1e7   : > { %v1158_v38 = vpack.c.bf16 %v1150_v28, %v1150_v28  ;;  %v1159_v40 = vpack.c.bf16 %v1151_v29, %v1151_v29  ;;  %v1160_v41 = vpack.c.bf16 %v1152_v30, %v1152_v30  ;;  %v1161_v42 = vpack.c.bf16 %v1153_v31, %v1153_v31 }
 0x1e8   : > { %v1037_v43 = vrot.slane %v1735_v34, %v2352_v32  ;;  %v1053_v44 = vrot.slane %v1737_v35, %v2352_v32  ;;  %v1069_v45 = vrot.slane %v1739_v36, %v2352_v32  ;;  %v1085_v46 = vrot.slane %v1741_v37, %v2352_v32  ;;  %v573_v61 = vpop.permute.xlu0 %572  ;;  %v570_v12 = vpop.permute.xlu1 %569 }
 0x1e9   : > { %1166 = vst.msk [vmem:[%s2394_s14] sm:$0xf] %vm855_vm2, %v1158_v38  ;;  %1167 = vst.msk [vmem:[%s2394_s14 + $0x4] sm:$0xf] %vm855_vm2, %v1159_v40  ;;  %v591_v47 = vcombine.low %v2365_v57, %v561_v23  ;;  %v592_v48 = vcombine.high %v2365_v57, %v561_v23  ;;  %v575_v49 = vcombine.low %v2330_v17, %v558_v8 }
 0x1ea   : > { %1168 = vst.msk [vmem:[%s2394_s14 + $0x8] sm:$0xf] %vm855_vm2, %v1160_v41  ;;  %1169 = vst.msk [vmem:[%s2394_s14 + $0xc] sm:$0xf] %vm855_vm2, %v1161_v42  ;;  %v576_v50 = vcombine.high %v2330_v17, %v558_v8  ;;  %v1102_v52 = vcombine.low %v1037_v43, %v1053_v44  ;;  %v1103_v53 = vcombine.high %v1037_v43, %v1053_v44 }
 0x1eb   : > { %v1134_v54 = vcombine.low %v1069_v45, %v1085_v46  ;;  %v1135_v55 = vcombine.high %v1069_v45, %v1085_v46  ;;  %v599_v56 = vrot.slane %v591_v47, %v2352_v32  ;;  %v606_v58 = vrot.slane %v592_v48, %v2352_v32 }
 0x1ec   : > { %v583_v59 = vrot.slane %v575_v49, %v2352_v32  ;;  %v590_v60 = vrot.slane %v576_v50, %v2352_v32  ;;  %v1110_v57 = vrot.slane %v1102_v52, %v2354_v39  ;;  %v1117_v62 = vrot.slane %v1103_v53, %v2354_v39  ;;  %v2424_v23 = vpop.permute.xlu0 %1175  ;;  %v1179_v50 = vpop.permute.xlu1 %1178 }
 0x1ed   : > { %v1142_v17 = vrot.slane %v1134_v54, %v2354_v39  ;;  %v1149_v63 = vrot.slane %v1135_v55, %v2354_v39  ;;  %v607_v24 = vcombine.low %v564_v51, %v570_v12  ;;  %v608_v25 = vcombine.high %v564_v51, %v570_v12 }
 0x1ee   : > { %v639_v0 = vcombine.low %v583_v59, %v599_v56  ;;  %v640_v1 = vcombine.high %v583_v59, %v599_v56  ;;  %v655_v2 = vcombine.low %v590_v60, %v606_v58  ;;  %v656_v3 = vcombine.high %v590_v60, %v606_v58 }
 0x1ef   : > { %v1154_v4 = vcombine.low %v1110_v57, %v1142_v17  ;;  %v1155_v5 = vcombine.high %v1110_v57, %v1142_v17  ;;  %v1156_v6 = vcombine.low %v1117_v62, %v1149_v63  ;;  %v1157_v7 = vcombine.high %v1117_v62, %v1149_v63 }
 0x1f0   : > { %v647_v8 = vrot.slane %v639_v0, %v2354_v39  ;;  %v654_v9 = vrot.slane %v640_v1, %v2354_v39  ;;  %v663_v10 = vrot.slane %v655_v2, %v2354_v39  ;;  %v670_v11 = vrot.slane %v656_v3, %v2354_v39  ;;  %v1182_v51 = vpop.permute.xlu0 %1181 }
 0x1f1   : > { %v1162_v13 = vpack.c.bf16 %v1154_v4, %v1154_v4  ;;  %v1163_v14 = vpack.c.bf16 %v1155_v5, %v1155_v5  ;;  %v1164_v15 = vpack.c.bf16 %v1156_v6, %v1156_v6  ;;  %v1165_v16 = vpack.c.bf16 %v1157_v7, %v1157_v7 }
 0x1f2   : > { %v1726_v19 = vcombine.low %v647_v8, %v654_v9  ;;  %v1728_v20 = vcombine.high %v647_v8, %v654_v9  ;;  %v1730_v21 = vcombine.low %v663_v10, %v670_v11  ;;  %v1732_v22 = vcombine.high %v663_v10, %v670_v11  ;;  %v1185_v9 = vpop.permute.xlu1 %1184 }
 0x1f3   : > { %1170 = vst.msk [vmem:[%s2394_s14 + $0x10] sm:$0xf] %vm855_vm2, %v1162_v13  ;;  %1171 = vst.msk [vmem:[%s2394_s14 + $0x14] sm:$0xf] %vm855_vm2, %v1163_v14  ;;  %v623_v26 = vcombine.low %v2388_v33, %v573_v61  ;;  %v624_v27 = vcombine.high %v2388_v33, %v573_v61  ;;  %v615_v34 = vrot.slane %v607_v24, %v2352_v32 }
 0x1f4   : > { %1172 = vst.msk [vmem:[%s2394_s14 + $0x18] sm:$0xf] %vm855_vm2, %v1164_v15  ;;  %1173 = vst.msk [vmem:[%s2394_s14 + $0x1c] sm:$0xf] %vm855_vm2, %v1165_v16  ;;  %v719_v28 = vrot.slane %v1726_v19, %v2352_v32  ;;  %v735_v29 = vrot.slane %v1728_v20, %v2352_v32  ;;  %v751_v30 = vrot.slane %v1730_v21, %v2352_v32  ;;  %v1188_v12 = vpop.permute.xlu0 %1187 }
 0x1f5   : > { %v767_v31 = vrot.slane %v1732_v22, %v2352_v32  ;;  %v622_v35 = vrot.slane %v608_v25, %v2352_v32  ;;  %v631_v36 = vrot.slane %v623_v26, %v2352_v32  ;;  %v638_v37 = vrot.slane %v624_v27, %v2352_v32 }
 0x1f6   : > { %v775_v38 = vcombine.low %v719_v28, %v735_v29  ;;  %v776_v40 = vcombine.high %v719_v28, %v735_v29  ;;  %v1196_v7 = vcombine.low %v2332_v18, %v1179_v50  ;;  %v1197_v8 = vcombine.high %v2332_v18, %v1179_v50 }
 0x1f7   : > { %v807_v41 = vcombine.low %v751_v30, %v767_v31  ;;  %v808_v33 = vcombine.high %v751_v30, %v767_v31  ;;  %v671_v42 = vcombine.low %v615_v34, %v631_v36  ;;  %v672_v43 = vcombine.high %v615_v34, %v631_v36 }
 0x1f8   : > { %v687_v44 = vcombine.low %v622_v35, %v638_v37  ;;  %v688_v45 = vcombine.high %v622_v35, %v638_v37  ;;  %v783_v46 = vrot.slane %v775_v38, %v2354_v39  ;;  %v790_v47 = vrot.slane %v776_v40, %v2354_v39 }
 0x1f9   : > { %v815_v48 = vrot.slane %v807_v41, %v2354_v39  ;;  %v822_v49 = vrot.slane %v808_v33, %v2354_v39  ;;  %v679_v52 = vrot.slane %v671_v42, %v2354_v39  ;;  %v686_v53 = vrot.slane %v672_v43, %v2354_v39  ;;  %v1191_v41 = vpop.permute.xlu1 %1190  ;;  %v1194_v33 = vpop.permute.xlu0 %1193 }
 0x1fa   : > { %v695_v54 = vrot.slane %v687_v44, %v2354_v39  ;;  %v702_v55 = vrot.slane %v688_v45, %v2354_v39  ;;  %v1212_v10 = vcombine.low %v2424_v23, %v1182_v51  ;;  %v1213_v11 = vcombine.high %v2424_v23, %v1182_v51 }
 0x1fb   : > { %v839_v56 = vcombine.low %v783_v46, %v815_v48  ;;  %v840_v58 = vcombine.high %v783_v46, %v815_v48  ;;  %v841_v59 = vcombine.low %v790_v47, %v822_v49  ;;  %v842_v60 = vcombine.high %v790_v47, %v822_v49 }
 0x1fc   : > { %v1727_v61 = vcombine.low %v679_v52, %v686_v53  ;;  %v1729_v57 = vcombine.high %v679_v52, %v686_v53  ;;  %v1731_v62 = vcombine.low %v695_v54, %v702_v55  ;;  %v1733_v17 = vcombine.high %v695_v54, %v702_v55 }
 0x1fd   : > { %v847_v63 = vpack.c.bf16 %v839_v56, %v839_v56  ;;  %v848_v0 = vpack.c.bf16 %v840_v58, %v840_v58  ;;  %v849_v1 = vpack.c.bf16 %v841_v59, %v841_v59  ;;  %v850_v2 = vpack.c.bf16 %v842_v60, %v842_v60 }
 0x1fe   : > { %v726_v3 = vrot.slane %v1727_v61, %v2352_v32  ;;  %v742_v4 = vrot.slane %v1729_v57, %v2352_v32  ;;  %v758_v5 = vrot.slane %v1731_v62, %v2352_v32  ;;  %v774_v6 = vrot.slane %v1733_v17, %v2352_v32 }
 0x1ff   : > { %856 = vst.msk [vmem:[%s2456_s7] sm:$0xf] %vm855_vm2, %v847_v63  ;;  %857 = vst.msk [vmem:[%s2456_s7 + $0x4] sm:$0xf] %vm855_vm2, %v848_v0  ;;  %v1204_v19 = vrot.slane %v1196_v7, %v2352_v32  ;;  %v1211_v20 = vrot.slane %v1197_v8, %v2352_v32  ;;  %v1220_v21 = vrot.slane %v1212_v10, %v2352_v32 }
 0x200   : > { %858 = vst.msk [vmem:[%s2456_s7 + $0x8] sm:$0xf] %vm855_vm2, %v849_v1  ;;  %859 = vst.msk [vmem:[%s2456_s7 + $0xc] sm:$0xf] %vm855_vm2, %v850_v2  ;;  %v791_v13 = vcombine.low %v726_v3, %v742_v4  ;;  %v792_v14 = vcombine.high %v726_v3, %v742_v4  ;;  %v823_v15 = vcombine.low %v758_v5, %v774_v6 }
 0x201   : > { %v824_v16 = vcombine.high %v758_v5, %v774_v6  ;;  %v1227_v22 = vrot.slane %v1213_v11, %v2352_v32  ;;  %v1260_v26 = vcombine.low %v1204_v19, %v1220_v21  ;;  %v1261_v27 = vcombine.high %v1204_v19, %v1220_v21 }
 0x202   : > { %v799_v18 = vrot.slane %v791_v13, %v2354_v39  ;;  %v806_v24 = vrot.slane %v792_v14, %v2354_v39  ;;  %v831_v25 = vrot.slane %v823_v15, %v2354_v39  ;;  %v1228_v50 = vcombine.low %v1185_v9, %v1191_v41 }
 0x203   : > { %v838_v23 = vrot.slane %v824_v16, %v2354_v39  ;;  %v1276_v28 = vcombine.low %v1211_v20, %v1227_v22  ;;  %v1277_v29 = vcombine.high %v1211_v20, %v1227_v22  ;;  %v1268_v36 = vrot.slane %v1260_v26, %v2354_v39 }
 0x204   : > { %v843_v30 = vcombine.low %v799_v18, %v831_v25  ;;  %v844_v31 = vcombine.high %v799_v18, %v831_v25  ;;  %v1275_v37 = vrot.slane %v1261_v27, %v2354_v39  ;;  %v1229_v51 = vcombine.high %v1185_v9, %v1191_v41 }
 0x205   : > { %v845_v34 = vcombine.low %v806_v24, %v838_v23  ;;  %v846_v35 = vcombine.high %v806_v24, %v838_v23  ;;  %v1284_v38 = vrot.slane %v1276_v28, %v2354_v39  ;;  %v1291_v40 = vrot.slane %v1277_v29, %v2354_v39 }
 0x206   : > { %v851_v42 = vpack.c.bf16 %v843_v30, %v843_v30  ;;  %v852_v43 = vpack.c.bf16 %v844_v31, %v844_v31  ;;  %v1742_v46 = vcombine.low %v1268_v36, %v1275_v37  ;;  %v1744_v47 = vcombine.high %v1268_v36, %v1275_v37 }
 0x207   : > { %v853_v44 = vpack.c.bf16 %v845_v34, %v845_v34  ;;  %v854_v45 = vpack.c.bf16 %v846_v35, %v846_v35  ;;  %v1746_v48 = vcombine.low %v1284_v38, %v1291_v40  ;;  %v1748_v49 = vcombine.high %v1284_v38, %v1291_v40 }
 0x208   : > { %860 = vst.msk [vmem:[%s2456_s7 + $0x10] sm:$0xf] %vm855_vm2, %v851_v42  ;;  %861 = vst.msk [vmem:[%s2456_s7 + $0x14] sm:$0xf] %vm855_vm2, %v852_v43  ;;  %v1244_v52 = vcombine.low %v1188_v12, %v1194_v33  ;;  %v1245_v53 = vcombine.high %v1188_v12, %v1194_v33  ;;  %v1340_v54 = vrot.slane %v1742_v46, %v2352_v32 }
 0x209   : > { %862 = vst.msk [vmem:[%s2456_s7 + $0x18] sm:$0xf] %vm855_vm2, %v853_v44  ;;  %863 = vst.msk [vmem:[%s2456_s7 + $0x1c] sm:$0xf] %vm855_vm2, %v854_v45  ;;  %v1356_v55 = vrot.slane %v1744_v47, %v2352_v32  ;;  %v1372_v56 = vrot.slane %v1746_v48, %v2352_v32  ;;  %v1388_v58 = vrot.slane %v1748_v49, %v2352_v32 }
 0x20a   : > { %v1236_v59 = vrot.slane %v1228_v50, %v2352_v32  ;;  %v1243_v60 = vrot.slane %v1229_v51, %v2352_v32  ;;  %v1252_v61 = vrot.slane %v1244_v52, %v2352_v32  ;;  %v1259_v57 = vrot.slane %v1245_v53, %v2352_v32 }
 0x20b   : > { %v1396_v62 = vcombine.low %v1340_v54, %v1356_v55  ;;  %v1397_v17 = vcombine.high %v1340_v54, %v1356_v55  ;;  %v1428_v63 = vcombine.low %v1372_v56, %v1388_v58  ;;  %v1429_v0 = vcombine.high %v1372_v56, %v1388_v58 }
 0x20c   : > { %v1292_v1 = vcombine.low %v1236_v59, %v1252_v61  ;;  %v1293_v2 = vcombine.high %v1236_v59, %v1252_v61  ;;  %v1308_v3 = vcombine.low %v1243_v60, %v1259_v57  ;;  %v1309_v4 = vcombine.high %v1243_v60, %v1259_v57 }
 0x20d   : > { %v1404_v5 = vrot.slane %v1396_v62, %v2354_v39  ;;  %v1411_v6 = vrot.slane %v1397_v17, %v2354_v39  ;;  %v1436_v7 = vrot.slane %v1428_v63, %v2354_v39  ;;  %v1443_v8 = vrot.slane %v1429_v0, %v2354_v39 }
 0x20e   : > { %v1300_v9 = vrot.slane %v1292_v1, %v2354_v39  ;;  %v1307_v10 = vrot.slane %v1293_v2, %v2354_v39  ;;  %v1316_v11 = vrot.slane %v1308_v3, %v2354_v39  ;;  %v1323_v12 = vrot.slane %v1309_v4, %v2354_v39 }
 0x20f   : > { %v1460_v13 = vcombine.low %v1404_v5, %v1436_v7  ;;  %v1461_v14 = vcombine.high %v1404_v5, %v1436_v7  ;;  %v1462_v15 = vcombine.low %v1411_v6, %v1443_v8  ;;  %v1463_v16 = vcombine.high %v1411_v6, %v1443_v8 }
 0x210   : > { %v1743_v19 = vcombine.low %v1300_v9, %v1307_v10  ;;  %v1745_v20 = vcombine.high %v1300_v9, %v1307_v10  ;;  %v1747_v21 = vcombine.low %v1316_v11, %v1323_v12  ;;  %v1749_v22 = vcombine.high %v1316_v11, %v1323_v12 }
 0x211   : > { %v1468_v18 = vpack.c.bf16 %v1460_v13, %v1460_v13  ;;  %v1469_v24 = vpack.c.bf16 %v1461_v14, %v1461_v14  ;;  %v1470_v25 = vpack.c.bf16 %v1462_v15, %v1462_v15  ;;  %v1471_v23 = vpack.c.bf16 %v1463_v16, %v1463_v16 }
 0x212   : > { %v1347_v26 = vrot.slane %v1743_v19, %v2352_v32  ;;  %v1363_v27 = vrot.slane %v1745_v20, %v2352_v32  ;;  %v1379_v28 = vrot.slane %v1747_v21, %v2352_v32  ;;  %v1395_v29 = vrot.slane %v1749_v22, %v2352_v32 }
 0x213   : > { %1476 = vst.msk [vmem:[%s2514_s9] sm:$0xf] %vm855_vm2, %v1468_v18  ;;  %1477 = vst.msk [vmem:[%s2514_s9 + $0x4] sm:$0xf] %vm855_vm2, %v1469_v24 }
 0x214   : > { %1478 = vst.msk [vmem:[%s2514_s9 + $0x8] sm:$0xf] %vm855_vm2, %v1470_v25  ;;  %1479 = vst.msk [vmem:[%s2514_s9 + $0xc] sm:$0xf] %vm855_vm2, %v1471_v23  ;;  %v1412_v30 = vcombine.low %v1347_v26, %v1363_v27  ;;  %v1413_v31 = vcombine.high %v1347_v26, %v1363_v27  ;;  %v1444_v34 = vcombine.low %v1379_v28, %v1395_v29 }
 0x215   : > { %v1445_v35 = vcombine.high %v1379_v28, %v1395_v29 }
 0x216   : > { %v1420_v36 = vrot.slane %v1412_v30, %v2354_v39  ;;  %v1427_v32 = vrot.slane %v1413_v31, %v2354_v39  ;;  %v1452_v37 = vrot.slane %v1444_v34, %v2354_v39 }
 0x217   : > { %v1459_v38 = vrot.slane %v1445_v35, %v2354_v39 }
 0x218   : > { %v1464_v40 = vcombine.low %v1420_v36, %v1452_v37  ;;  %v1465_v41 = vcombine.high %v1420_v36, %v1452_v37 }
 0x219   : > { %v1466_v33 = vcombine.low %v1427_v32, %v1459_v38  ;;  %v1467_v42 = vcombine.high %v1427_v32, %v1459_v38 }
 0x21a   : > { %v1472_v43 = vpack.c.bf16 %v1464_v40, %v1464_v40  ;;  %v1473_v44 = vpack.c.bf16 %v1465_v41, %v1465_v41 }
 0x21b   : > { %v1474_v45 = vpack.c.bf16 %v1466_v33, %v1466_v33  ;;  %v1475_v46 = vpack.c.bf16 %v1467_v42, %v1467_v42 }
 0x21c   : > { %1480 = vst.msk [vmem:[%s2514_s9 + $0x10] sm:$0xf] %vm855_vm2, %v1472_v43  ;;  %1481 = vst.msk [vmem:[%s2514_s9 + $0x14] sm:$0xf] %vm855_vm2, %v1473_v44 }
 0x21d   : > { %1482 = vst.msk [vmem:[%s2514_s9 + $0x18] sm:$0xf] %vm855_vm2, %v1474_v45  ;;  %1483 = vst.msk [vmem:[%s2514_s9 + $0x1c] sm:$0xf] %vm855_vm2, %v1475_v46 }
 0x21e PF: > { %s22_s26 = sadd.s32 1, %s2065_s26   ;;  %s2578_s15 = smov %s2272_s21 }
 0x21f   : > { %p19_p4 = scmp.ge.s32.totalorder %s22_s26, 4   ;;  %s2579_s21 = smov %s2049_s22 }
 0x220   : > { %s2580_s22 = smov %s2053_s23  ;;  %s2581_s23 = smov %s2578_s15 }
 0x221   : > { %s2582_s24 = smov %s2061_s25  ;;  %s2583_s25 = smov %s2585_s19 }
 0x222   :  { %21 = sbr.rel (!%p19_p4) target bundleno = 6 (0x6), region = 112 }
 0x229   :  { %1555 = vsyncpa [#allocation3], 1 }
 0x22a   :  { %1557 = vsyncpa [#allocation3 + $0x1], 1 }
 0x22b   :  { %1558 = vsyncpa [#allocation5], 1 }
 0x22c   :  { %1559 = vsyncpa [#allocation8], 1 }

// kernel: tpu_custom_call.1
= control target key start
LH: loop header
LB: loop body
LE: loop exit
PB: predicated region body
PF: predicated region fallthrough
CT: control target
= control target key end

     0   :  { %12 = vsyncpa [#allocation3], 0  ;;  %s2558_s0 = inlined_call_operand.hbm [shape: f32[2,8,32], index: 0, kind: input, shape index: {}]   ;;  %s2559_s1 = inlined_call_operand.hbm [shape: bf16[32,32], index: 1, kind: input, shape index: {}]   ;;  %s2560_s2 = inlined_call_operand.hbm [shape: bf16[32,32], index: 2, kind: input, shape index: {}]   ;;  %s2561_s3 = inlined_call_operand.hbm [shape: bf16[32,32], index: 3, kind: input, shape index: {}]   ;;  %s2562_s4 = inlined_call_operand.vmem [shape: bf16[2,8,8,4], index: 4, kind: output, shape index: {0}]   ;;  %s2563_s5 = inlined_call_operand.vmem [shape: bf16[2,8,8,4], index: 5, kind: output, shape index: {1}]   ;;  %s2564_s6 = inlined_call_operand.vmem [shape: bf16[2,8,8,4], index: 6, kind: output, shape index: {2}]  }
   0x1   :  { %14 = vsyncpa [#allocation3 + $0x1], 0 }
   0x2   :  { %15 = vsyncpa [#allocation5], 0 }
   0x3   :  { %16 = vsyncpa [#allocation8], 0  ;;  %s2119_s21 = smov 0   ;;  %s2121_s22 = smov 0  }
   0x4   :  { %s2123_s23 = smov 0   ;;  %s2125_s24 = smov 0  }
   0x5   :  { %s2127_s25 = smov 0   ;;  %s2129_s26 = smov 0  }
   0x6 LB: > { %s1697_s27 = sadd.s32 4294967295, %s2065_s26   ;;  %p56_p0 = scmp.ne.s32.totalorder %s2049_s22, %s2045_s21  ;;  %s2065_s26 = sphi %s2129_s26, %s22_s26   ;;  %s2061_s25 = sphi %s2127_s25, %s2583_s25   ;;  %s2057_s24 = sphi %s2125_s24, %s2582_s24   ;;  %s2053_s23 = sphi %s2123_s23, %s2581_s23   ;;  %s2049_s22 = sphi %s2121_s22, %s2580_s22   ;;  %s2045_s21 = sphi %s2119_s21, %s2579_s21  }
   0x7   : > { %p2149_p1 = scmp.eq.s32.totalorder %s1697_s27, 0  ;;  %p1699_p2 = scmp.ge.s32.totalorder %s2065_s26, 1 }
   0x8   : > { %p214_p3 = scmp.lt.s32.totalorder %s2065_s26, 3  ;;  %s2067_s7 = smov [#allocation4]  }
   0x9   : > { %s2569_s28 = scalar_select %p2149_p1, 1, 0 }
   0xa   : > { %p2157_p4 = por %p2149_p1, %p56_p0  ;;  %p2161_p5 = pnand %p1699_p2, %p214_p3 }
   0xb   : > { %s226_s8 = sshll.u32 %s2067_s7, 4  ;;  %s2068_s10 = smov [#allocation6]   ;;  %s2165_s8 = int_to_ptr.vmem [resolvable:$true] %s226_s8 }
   0xc   : > { %s2570_s29 = scalar_select %p2157_p4, 1, 0 }
   0xd   : > { %s2571_s30 = scalar_select %p2161_p5, 1, 0 }
   0xe   : > { %p1802_p6 = pneg %p2161_p5  ;;  %s239_s11 = sshll.u32 %s2068_s10, 4  ;;  %s2175_s11 = int_to_ptr.vmem [resolvable:$true] %s239_s11 }
   0xf   : > { %s2069_s12 = smov [#allocation7]   ;;  %s1893_s16 = scalar_lea.hbm %s2559_s1, 256 }
  0x10   : > { %p2171_p7 = pnand %p1802_p6, %p2149_p1  ;;  %s2177_s13 = sshll.u32 %s2069_s12, 4  ;;  %s253_s13 = int_to_ptr.vmem [resolvable:$true] %s2177_s13 }
  0x11   : > { %p1894_p8 = scmp.ne.s32.totalorder %s2559_s1, %s1893_s16  ;;  %p1900_p12 = scmp.lt.u32.totalorder %s1893_s16, %s2559_s1 }
  0x12   : > { %p2187_p9 = pneg %p2171_p7 }
  0x14   : > { %p1896_p10 = pnand %p2187_p9, %p1894_p8 }
  0x16   : > { %p1897_p11 = pneg %p1896_p10 }
  0x18   : > { %p1902_p13 = pnand %p1900_p12, %p1897_p11 }
  0x1a   : > { %1905 = shalt.err (!%p1902_p13)
}
  0x1b   : > { %s1906_s27 = scalar_lea.vmem %s2165_s8, 256  ;;  %p1914_p6 = scmp.lt.s32.totalorder %s2165_s8, %s2165_s8 }
  0x1c   : > { %p1907_p0 = scmp.ne.s32.totalorder %s2165_s8, %s1906_s27  ;;  %p1915_p1 = scmp.lt.s32.totalorder %s1906_s27, %s1906_s27 }
  0x1e   : > { %p1909_p2 = pnand %p1907_p0, %p2187_p9  ;;  %p1916_p8 = por %p1915_p1, %p1914_p6 }
  0x20   : > { %p1910_p3 = pneg %p1909_p2 }
  0x22   : > { %p1917_p10 = pnand %p1916_p8, %p1910_p3 }
  0x24   : > { %1920 = shalt.err (!%p1917_p10)
}
  0x25   : > { %s2070_s7 = smov 64   ;;  %s2071_s10 = smov 4  }
  0x26   : > { %1805 = dma.hbm_to_vmem [thread:$0]  (!%p2171_p7), %s2559_s1, 256, %s2165_s8, [#allocation5], %s2070_s7, %s2070_s7, %s2071_s10  }
  0x27   : > { %s1921_s17 = scalar_lea.hbm %s2560_s2, 256 }
  0x28   : > { %p1922_p1 = scmp.ne.s32.totalorder %s2560_s2, %s1921_s17  ;;  %p1928_p13 = scmp.lt.u32.totalorder %s1921_s17, %s2560_s2 }
  0x2a   : > { %p1924_p11 = pnand %p1922_p1, %p2187_p9 }
  0x2c   : > { %p1925_p12 = pneg %p1924_p11 }
  0x2e   : > { %p1930_p0 = pnand %p1928_p13, %p1925_p12 }
  0x30   : > { %1933 = shalt.err (!%p1930_p0)
}
  0x31   : > { %s1934_s8 = scalar_lea.vmem %s2175_s11, 256  ;;  %p1942_p8 = scmp.lt.s32.totalorder %s2175_s11, %s2175_s11 }
  0x32   : > { %p1935_p2 = scmp.ne.s32.totalorder %s2175_s11, %s1934_s8  ;;  %p1943_p10 = scmp.lt.s32.totalorder %s1934_s8, %s1934_s8 }
  0x34   : > { %p1937_p3 = pnand %p1935_p2, %p2187_p9  ;;  %p1944_p1 = por %p1943_p10, %p1942_p8 }
  0x36   : > { %p1938_p6 = pneg %p1937_p3 }
  0x38   : > { %p1945_p11 = pnand %p1944_p1, %p1938_p6 }
  0x3a   : > { %1948 = shalt.err (!%p1945_p11)
}
  0x3b   : > { %1808 = dma.hbm_to_vmem [thread:$0]  (!%p2171_p7), %s2560_s2, 256, %s2175_s11, [#allocation5], %s2070_s7, %s2070_s7, %s2071_s10  }
  0x3c   : > { %s1949_s17 = scalar_lea.hbm %s2561_s3, 256 }
  0x3d   : > { %p1950_p12 = scmp.ne.s32.totalorder %s2561_s3, %s1949_s17  ;;  %p1956_p2 = scmp.lt.u32.totalorder %s1949_s17, %s2561_s3 }
  0x3f   : > { %p1952_p13 = pnand %p1950_p12, %p2187_p9 }
  0x41   : > { %p1953_p0 = pneg %p1952_p13 }
  0x43   : > { %p1958_p3 = pnand %p1956_p2, %p1953_p0 }
  0x45   : > { %1961 = shalt.err (!%p1958_p3)
}
  0x46   : > { %s1962_s8 = scalar_lea.vmem %s253_s13, 256  ;;  %p1970_p1 = scmp.lt.s32.totalorder %s253_s13, %s253_s13 }
  0x47   : > { %p1963_p6 = scmp.ne.s32.totalorder %s253_s13, %s1962_s8  ;;  %p1971_p11 = scmp.lt.s32.totalorder %s1962_s8, %s1962_s8 }
  0x49   : > { %p1965_p8 = pnand %p1963_p6, %p2187_p9  ;;  %p1972_p4 = por %p1971_p11, %p1970_p1 }
  0x4b   : > { %p1966_p10 = pneg %p1965_p8 }
  0x4d   : > { %p1973_p5 = pnand %p1972_p4, %p1966_p10 }
  0x4f   : > { %1976 = shalt.err (!%p1973_p5)
}
  0x50   : > { %1811 = dma.hbm_to_vmem [thread:$0]  (!%p2171_p7), %s2561_s3, 256, %s253_s13, [#allocation8], %s2070_s7, %s2070_s7, %s2071_s10  }
  0x51   : > { %s34_s19 = sadd.s32 1, %s2061_s25  ;;  %p50_p4 = scmp.ne.s32.totalorder %s2053_s23, %s2049_s22 }
  0x52   : > { %p36_p5 = scmp.ge.s32.totalorder %s34_s19, 2  ;;  %p51_p9 = scmp.eq.s32.totalorder %s2065_s26, 0 }
  0x53   : > { %s43_s9 = sadd.s32 1, %s2053_s23  ;;  %s266_s14 = sand.u32 1, %s2053_s23  }
  0x54   : > { %s2585_s19 = smov (%p36_p5, %s34_s19), 0  ;;  %p52_p12 = por %p51_p9, %p50_p4 }
  0x55   : > { %p1819_p13 = scmp.lt.s32.totalorder %s2065_s26, 2  ;;  %s38_s15 = ssub.s32 %s2061_s25, %s2585_s19 }
  0x56   : > { %s1704_s16 = sshll.u32 %s266_s14, 3  ;;  %p41_p0 = scmp.eq.s32.totalorder %s38_s15, 0 }
  0x57   : > { %s1705_s17 = sshll.u32 %s2061_s25, 7  ;;  %s270_s18 = scalar_lea.vmem [#allocation2], %s1704_s16 }
  0x58   : > { %s278_s20 = sshll.u32 %s270_s18, 4  ;;  %s2277_s10 = scalar_lea.hbm %s2558_s0, %s1705_s17  ;;  %s2279_s20 = int_to_ptr.vmem [resolvable:$true] %s278_s20 }
  0x59   : > { %s2272_s21 = scalar_select %p41_p0, %s2053_s23, %s43_s9  }
  0x5a   : > { %p2281_p7 = pnand %p1819_p13, %p52_p12  ;;  %s267_s8 = scalar_lea.sflag [#allocation3], %s266_s14 }
  0x5b   : > { %s1977_s11 = scalar_lea.hbm %s2277_s10, 128  ;;  %s1982_s15 = scalar_lea.hbm %s2558_s0, 256 }
  0x5c   : > { %p1978_p2 = scmp.ne.s32.totalorder %s2277_s10, %s1977_s11  ;;  %p1979_p3 = pneg %p2281_p7 }
  0x5d   : > { %p1983_p10 = scmp.lt.u32.totalorder %s2277_s10, %s2558_s0  ;;  %p1984_p1 = scmp.lt.u32.totalorder %s1982_s15, %s1977_s11 }
  0x5e   : > { %p1980_p6 = pnand %p1979_p3, %p1978_p2  ;;  %p1986_p4 = scmp.lt.u32.totalorder %s1977_s11, %s2277_s10 }
  0x5f   : > { %p1985_p11 = por %p1984_p1, %p1983_p10 }
  0x60   : > { %p1981_p8 = pneg %p1980_p6 }
  0x61   : > { %p1987_p5 = por %p1986_p4, %p1985_p11 }
  0x63   : > { %p1988_p9 = pnand %p1987_p5, %p1981_p8 }
  0x65   : > { %1991 = shalt.err (!%p1988_p9)
}
  0x66   : > { %s1992_s14 = scalar_lea.vmem %s2279_s20, 128  ;;  %s2072_s18 = smov [#allocation2]  }
  0x67   : > { %p1993_p12 = scmp.ne.s32.totalorder %s2279_s20, %s1992_s14  ;;  %s1997_s13 = sshll.u32 %s2072_s18, 4  ;;  %s1998_s13 = int_to_ptr.vmem [resolvable:$false] %s1997_s13 }
  0x68   : > { %s1999_s7 = scalar_lea.vmem %s1998_s13, 256  ;;  %p2000_p2 = scmp.lt.s32.totalorder %s2279_s20, %s1998_s13 }
  0x69   : > { %p1995_p13 = pnand %p1993_p12, %p1979_p3  ;;  %p2001_p6 = scmp.lt.s32.totalorder %s1999_s7, %s1992_s14 }
  0x6b   : > { %p1996_p0 = pneg %p1995_p13  ;;  %p2002_p10 = por %p2001_p6, %p2000_p2 }
  0x6d   : > { %p2003_p1 = pnand %p2002_p10, %p1996_p0 }
  0x6f   : > { %2006 = shalt.err (!%p2003_p1)
}
  0x70   : > { %1815 = dma.hbm_to_vmem [thread:$0]  (!%p2281_p7), %s2277_s10, 128, %s2279_s20, %s267_s8  }
  0x71   : > { %p2575_p8 = scmp.ne.s32.totalorder %s2571_s30, 0 }
  0x72   : > { %s289_s11 = sand.u32 (!%p2575_p8), 1, %s2049_s22   ;;  %p2576_p3 = scmp.ne.s32.totalorder (!%p2575_p8), %s2570_s29, 0 }
  0x73   : > { %287 = sbr.rel (%p2575_p8) target bundleno = 542 (0x21e), region = 36  ;;  %s1707_s12 = sshll.u32 (!%p2575_p8), %s289_s11, 3 }
  0x74   : > { %s290_s9 = scalar_lea.sflag (!%p2575_p8), [#allocation3], %s289_s11  ;;  %s293_s15 = scalar_lea.vmem (!%p2575_p8), [#allocation2], %s1707_s12 }
  0x7a   : > { %2032 = dma.done.wait (%p2576_p3), %s290_s9, 128  }
  0x7b   : > { %2034 = vsyncadd (%p2576_p3), %s290_s9, 4294967168  ;;  %p2577_p11 = scmp.ne.s32.totalorder %s2569_s28, 0 }
  0x7d   : > { %2036 = dma.done.wait (%p2577_p11), [#allocation5], 512  }
  0x7e   : > { %2038 = vsyncadd (%p2577_p11), [#allocation5], 4294966784 }
  0x7f   : > { %2040 = dma.done.wait (%p2577_p11), [#allocation8], 256  }
  0x80   : > { %2042 = vsyncadd (%p2577_p11), [#allocation8], 4294967040  ;;  %v2073_v0 = vmov 0.0   ;;  %vm2074_vm0 = vmmov 0   ;;  %v1887_v1 = vld [vmem:[#allocation6] sm:$0xff]   ;;  %v1888_v2 = vld [vmem:[#allocation6 + $0x8] sm:$0xff]   ;;  %v580_v24 = vlaneseq }
  0x81   : > { %1772 = vmatprep.subr.bf16.mxu1 %v2073_v0  ;;  %1764 = vmatprep.subr.bf16.mxu0 %v2073_v0  ;;  %v1889_v3 = vld [vmem:[#allocation4] sm:$0xff]   ;;  %v378_v4 = vld [vmem:[%s293_s15] sm:$0xff]  ;;  %v1890_v5 = vld [vmem:[#allocation4 + $0x8] sm:$0xff]   ;;  %vm396_vm1 = vcmask 261120   ;;  %s2075_s28 = smov 120   ;;  %s2076_s29 = smov 124  }
  0x82   : > { %1776 = vmatprep.mubr.msk.bf16.mxu1 %vm2074_vm0, %v2073_v0  ;;  %1768 = vmatprep.mubr.msk.bf16.mxu0 %vm2074_vm0, %v2073_v0  ;;  %v379_v6 = vpack.c.bf16 %v378_v4, %v378_v4  ;;  %v1891_v7 = vld [vmem:[#allocation7] sm:$0xff]   ;;  %v1892_v8 = vld [vmem:[#allocation7 + $0x8] sm:$0xff]   ;;  %s2077_s30 = smov 112   ;;  %s2078_s20 = smov 116   ;;  %v2082_v22 = vmov 1983009808  }
  0x83   : > { %1773 = vmatpush3.bf16.msra.mxu1 %v1887_v1  ;;  %1765 = vmatpush3.bf16.msra.mxu0 %v1889_v3  ;;  %s2079_s10 = smov 104   ;;  %s2080_s27 = smov 108   ;;  %v578_v23 = vunpack.c.l.s4 %v2082_v22  ;;  %v2083_v25 = vmov 1934713408   ;;  %v581_v28 = vshrl.u32 %v580_v24, 7  ;;  %vm855_vm2 = vcmask 27648  }
  0x84   : > { %1774 = vmatprep.subr.bf16.mxu1 %v2073_v0  ;;  %1766 = vmatprep.subr.bf16.mxu0 %v2073_v0  ;;  %s2081_s8 = smov 100   ;;  %v642_v26 = vunpack.c.l.s4 %v2083_v25  ;;  %p353_p7 = scmp.lt.s32.totalorder %s2057_s24, 1 }
  0x85   : > { %v579_v27 = vunpack.c.0.s8 %v578_v23 }
  0x86   : > { %v643_v31 = vunpack.c.0.s8 %v642_v26  ;;  %s2587_s24 = smov (!%p353_p7, %s2057_s24), 1 }
  0x87   : > { %1775 = vmatpush3.bf16.msra.mxu1 %v1888_v2  ;;  %1767 = vmatpush3.bf16.msra.mxu0 %v1890_v5  ;;  %v2352_v32 = vsub.s32 %v579_v27, %v581_v28  ;;  %s2378_s16 = sshll.u32 %s2587_s24, 5 }
  0x88   : > { %1780 = vmatprep.subr.bf16.mxu0 %v2073_v0  ;;  %v2354_v39 = vsub.s32 %v643_v31, %v581_v28  ;;  %s2394_s14 = scalar_lea.vmem %s2563_s5, %s2378_s16  ;;  %s2456_s7 = scalar_lea.vmem %s2562_s4, %s2378_s16 }
  0x89   : > { %s2514_s9 = scalar_lea.vmem %s2564_s6, %s2378_s16 }
  0x8a   : > { %1777 = vmatmul.mubr.msk.bf16.vlgmr.msra.gmra.mrb[0].mxu1 %vm396_vm1, %v379_v6  ;;  %1769 = vmatmul.mubr.msk.bf16.vlgmr.msra.gmra.mrb[0].mxu0 %vm396_vm1, %v379_v6 }
  0x8b   : > { %1781 = vmatpush3.bf16.msra.mxu0 %v1891_v7  ;;  %1784 = vmatprep.mubr.msk.bf16.mxu0 %vm2074_vm0, %v2073_v0 }
  0x8c   : > { %1782 = vmatprep.subr.bf16.mxu0 %v2073_v0 }
  0x8f   : > { %1783 = vmatpush3.bf16.msra.mxu0 %v1892_v8 }
  0x92   : > { %1785 = vmatmul.mubr.msk.bf16.vlgmr.msra.gmra.mrb[4].mxu0 %vm396_vm1, %v379_v6 }
 0x15d   : > { %v491_v9 = vpop.f32.mrb[0].mxu1  ;;  %v434_v12 = vpop.f32.mrb[0].mxu0 }
 0x15e   : > { %868 = vrot.lane.b32.xlu0 %v491_v9, %s2075_s28  ;;  %865 = vrot.lane.b32.xlu1 %v491_v9, %s2076_s29  ;;  %v1778_v10 = vpop.f32.mrb[1].mxu1  ;;  %v1770_v14 = vpop.f32.mrb[1].mxu0  ;;  %v2330_v17 = vmul.f32 0.5, %v434_v12 }
 0x15f   : > { %v494_v11 = vpop.f32.mrb[2].mxu1  ;;  %v437_v15 = vpop.f32.mrb[2].mxu0 }
 0x160   : > { %v1779_v13 = vpop.f32.mrb[3].mxu1  ;;  %v1771_v16 = vpop.f32.mrb[3].mxu0 }
 0x162   : > { %874 = vrot.lane.b32.xlu0 %v491_v9, %s2077_s30  ;;  %871 = vrot.lane.b32.xlu1 %v491_v9, %s2078_s20 }
 0x165   : > { %v2332_v18 = vpop.f32.mrb[4].mxu0 }
 0x166   : > { %880 = vrot.lane.b32.xlu0 %v491_v9, %s2079_s10  ;;  %877 = vrot.lane.b32.xlu1 %v491_v9, %s2080_s27  ;;  %v1786_v19 = vpop.f32.mrb[5].mxu0 }
 0x167   : > { %v550_v20 = vpop.f32.mrb[6].mxu0 }
 0x168   : > { %v1787_v21 = vpop.f32.mrb[7].mxu0 }
 0x16a   : > { %883 = vrot.lane.b32.xlu1 %v491_v9, %s2081_s8  ;;  %554 = vrot.lane.b32.xlu0 %v2330_v17, %s2076_s29 }
 0x16e   : > { %560 = vrot.lane.b32.xlu1 %v2330_v17, %s2078_s20  ;;  %557 = vrot.lane.b32.xlu0 %v2330_v17, %s2075_s28 }
 0x172   : > { %563 = vrot.lane.b32.xlu1 %v2330_v17, %s2077_s30  ;;  %566 = vrot.lane.b32.xlu0 %v2330_v17, %s2080_s27 }
 0x176   : > { %569 = vrot.lane.b32.xlu1 %v2330_v17, %s2079_s10  ;;  %572 = vrot.lane.b32.xlu0 %v2330_v17, %s2081_s8 }
 0x17a   : > { %1178 = vrot.lane.b32.xlu1 %v2332_v18, %s2075_s28  ;;  %1175 = vrot.lane.b32.xlu0 %v2332_v18, %s2076_s29 }
 0x17e   : > { %1184 = vrot.lane.b32.xlu1 %v2332_v18, %s2077_s30  ;;  %1181 = vrot.lane.b32.xlu0 %v2332_v18, %s2078_s20 }
 0x182   : > { %1190 = vrot.lane.b32.xlu1 %v2332_v18, %s2079_s10  ;;  %1187 = vrot.lane.b32.xlu0 %v2332_v18, %s2080_s27 }
 0x186   : > { %1193 = vrot.lane.b32.xlu0 %v2332_v18, %s2081_s8 }
 0x1d0   : > { %v869_v29 = vpop.permute.xlu0 %868  ;;  %v866_v30 = vpop.permute.xlu1 %865 }
 0x1d1   : > { %v886_v33 = vcombine.low %v491_v9, %v869_v29  ;;  %v887_v34 = vcombine.high %v491_v9, %v869_v29 }
 0x1d3   : > { %v894_v40 = vrot.slane %v886_v33, %v2352_v32  ;;  %v901_v41 = vrot.slane %v887_v34, %v2352_v32 }
 0x1d4   : > { %v875_v35 = vpop.permute.xlu0 %874  ;;  %v872_v36 = vpop.permute.xlu1 %871 }
 0x1d5   : > { %v902_v37 = vcombine.low %v866_v30, %v872_v36  ;;  %v903_v38 = vcombine.high %v866_v30, %v872_v36 }
 0x1d7   : > { %v910_v42 = vrot.slane %v902_v37, %v2352_v32  ;;  %v917_v43 = vrot.slane %v903_v38, %v2352_v32 }
 0x1d8   : > { %v881_v44 = vpop.permute.xlu0 %880  ;;  %v878_v45 = vpop.permute.xlu1 %877 }
 0x1d9   : > { %v950_v46 = vcombine.low %v894_v40, %v910_v42  ;;  %v951_v47 = vcombine.high %v894_v40, %v910_v42  ;;  %v966_v48 = vcombine.low %v901_v41, %v917_v43  ;;  %v967_v49 = vcombine.high %v901_v41, %v917_v43 }
 0x1da   : > { %v918_v54 = vcombine.low %v875_v35, %v881_v44  ;;  %v919_v55 = vcombine.high %v875_v35, %v881_v44 }
 0x1db   : > { %v958_v50 = vrot.slane %v950_v46, %v2354_v39  ;;  %v965_v51 = vrot.slane %v951_v47, %v2354_v39  ;;  %v974_v52 = vrot.slane %v966_v48, %v2354_v39  ;;  %v981_v53 = vrot.slane %v967_v49, %v2354_v39 }
 0x1dc   : > { %v884_v56 = vpop.permute.xlu1 %883  ;;  %v2365_v57 = vpop.permute.xlu0 %554  ;;  %v926_v4 = vrot.slane %v918_v54, %v2352_v32  ;;  %v933_v5 = vrot.slane %v919_v55, %v2352_v32 }
 0x1dd   : > { %v1734_v58 = vcombine.low %v958_v50, %v965_v51  ;;  %v1736_v59 = vcombine.high %v958_v50, %v965_v51  ;;  %v1738_v60 = vcombine.low %v974_v52, %v981_v53  ;;  %v1740_v61 = vcombine.high %v974_v52, %v981_v53 }
 0x1de   : > { %v934_v62 = vcombine.low %v878_v45, %v884_v56  ;;  %v935_v63 = vcombine.high %v878_v45, %v884_v56 }
 0x1df   : > { %v1030_v0 = vrot.slane %v1734_v58, %v2352_v32  ;;  %v1046_v1 = vrot.slane %v1736_v59, %v2352_v32  ;;  %v1062_v2 = vrot.slane %v1738_v60, %v2352_v32  ;;  %v1078_v3 = vrot.slane %v1740_v61, %v2352_v32 }
 0x1e0   : > { %v942_v6 = vrot.slane %v934_v62, %v2352_v32  ;;  %v949_v7 = vrot.slane %v935_v63, %v2352_v32  ;;  %v558_v8 = vpop.permute.xlu0 %557  ;;  %v561_v23 = vpop.permute.xlu1 %560 }
 0x1e1   : > { %v1086_v9 = vcombine.low %v1030_v0, %v1046_v1  ;;  %v1087_v10 = vcombine.high %v1030_v0, %v1046_v1  ;;  %v1118_v11 = vcombine.low %v1062_v2, %v1078_v3  ;;  %v1119_v12 = vcombine.high %v1062_v2, %v1078_v3 }
 0x1e2   : > { %v982_v13 = vcombine.low %v926_v4, %v942_v6  ;;  %v983_v14 = vcombine.high %v926_v4, %v942_v6  ;;  %v998_v15 = vcombine.low %v933_v5, %v949_v7  ;;  %v999_v16 = vcombine.high %v933_v5, %v949_v7 }
 0x1e3   : > { %v1094_v19 = vrot.slane %v1086_v9, %v2354_v39  ;;  %v1101_v20 = vrot.slane %v1087_v10, %v2354_v39  ;;  %v1126_v21 = vrot.slane %v1118_v11, %v2354_v39  ;;  %v1133_v22 = vrot.slane %v1119_v12, %v2354_v39 }
 0x1e4   : > { %v990_v24 = vrot.slane %v982_v13, %v2354_v39  ;;  %v997_v25 = vrot.slane %v983_v14, %v2354_v39  ;;  %v1006_v26 = vrot.slane %v998_v15, %v2354_v39  ;;  %v1013_v27 = vrot.slane %v999_v16, %v2354_v39  ;;  %v2388_v33 = vpop.permute.xlu0 %566  ;;  %v564_v51 = vpop.permute.xlu1 %563 }
 0x1e5   : > { %v1150_v28 = vcombine.low %v1094_v19, %v1126_v21  ;;  %v1151_v29 = vcombine.high %v1094_v19, %v1126_v21  ;;  %v1152_v30 = vcombine.low %v1101_v20, %v1133_v22  ;;  %v1153_v31 = vcombine.high %v1101_v20, %v1133_v22 }
 0x1e6   : > { %v1735_v34 = vcombine.low %v990_v24, %v997_v25  ;;  %v1737_v35 = vcombine.high %v990_v24, %v997_v25  ;;  %v1739_v36 = vcombine.low %v1006_v26, %v1013_v27  ;;  %v1741_v37 = vcombine.high %v1006_v26, %v1013_v27 }
 0x1e7   : > { %v1158_v38 = vpack.c.bf16 %v1150_v28, %v1150_v28  ;;  %v1159_v40 = vpack.c.bf16 %v1151_v29, %v1151_v29  ;;  %v1160_v41 = vpack.c.bf16 %v1152_v30, %v1152_v30  ;;  %v1161_v42 = vpack.c.bf16 %v1153_v31, %v1153_v31 }
 0x1e8   : > { %v1037_v43 = vrot.slane %v1735_v34, %v2352_v32  ;;  %v1053_v44 = vrot.slane %v1737_v35, %v2352_v32  ;;  %v1069_v45 = vrot.slane %v1739_v36, %v2352_v32  ;;  %v1085_v46 = vrot.slane %v1741_v37, %v2352_v32  ;;  %v573_v61 = vpop.permute.xlu0 %572  ;;  %v570_v12 = vpop.permute.xlu1 %569 }
 0x1e9   : > { %1166 = vst.msk [vmem:[%s2394_s14] sm:$0xf] %vm855_vm2, %v1158_v38  ;;  %1167 = vst.msk [vmem:[%s2394_s14 + $0x4] sm:$0xf] %vm855_vm2, %v1159_v40  ;;  %v591_v47 = vcombine.low %v2365_v57, %v561_v23  ;;  %v592_v48 = vcombine.high %v2365_v57, %v561_v23  ;;  %v575_v49 = vcombine.low %v2330_v17, %v558_v8 }
 0x1ea   : > { %1168 = vst.msk [vmem:[%s2394_s14 + $0x8] sm:$0xf] %vm855_vm2, %v1160_v41  ;;  %1169 = vst.msk [vmem:[%s2394_s14 + $0xc] sm:$0xf] %vm855_vm2, %v1161_v42  ;;  %v576_v50 = vcombine.high %v2330_v17, %v558_v8  ;;  %v1102_v52 = vcombine.low %v1037_v43, %v1053_v44  ;;  %v1103_v53 = vcombine.high %v1037_v43, %v1053_v44 }
 0x1eb   : > { %v1134_v54 = vcombine.low %v1069_v45, %v1085_v46  ;;  %v1135_v55 = vcombine.high %v1069_v45, %v1085_v46  ;;  %v599_v56 = vrot.slane %v591_v47, %v2352_v32  ;;  %v606_v58 = vrot.slane %v592_v48, %v2352_v32 }
 0x1ec   : > { %v583_v59 = vrot.slane %v575_v49, %v2352_v32  ;;  %v590_v60 = vrot.slane %v576_v50, %v2352_v32  ;;  %v1110_v57 = vrot.slane %v1102_v52, %v2354_v39  ;;  %v1117_v62 = vrot.slane %v1103_v53, %v2354_v39  ;;  %v2424_v23 = vpop.permute.xlu0 %1175  ;;  %v1179_v50 = vpop.permute.xlu1 %1178 }
 0x1ed   : > { %v1142_v17 = vrot.slane %v1134_v54, %v2354_v39  ;;  %v1149_v63 = vrot.slane %v1135_v55, %v2354_v39  ;;  %v607_v24 = vcombine.low %v564_v51, %v570_v12  ;;  %v608_v25 = vcombine.high %v564_v51, %v570_v12 }
 0x1ee   : > { %v639_v0 = vcombine.low %v583_v59, %v599_v56  ;;  %v640_v1 = vcombine.high %v583_v59, %v599_v56  ;;  %v655_v2 = vcombine.low %v590_v60, %v606_v58  ;;  %v656_v3 = vcombine.high %v590_v60, %v606_v58 }
 0x1ef   : > { %v1154_v4 = vcombine.low %v1110_v57, %v1142_v17  ;;  %v1155_v5 = vcombine.high %v1110_v57, %v1142_v17  ;;  %v1156_v6 = vcombine.low %v1117_v62, %v1149_v63  ;;  %v1157_v7 = vcombine.high %v1117_v62, %v1149_v63 }
 0x1f0   : > { %v647_v8 = vrot.slane %v639_v0, %v2354_v39  ;;  %v654_v9 = vrot.slane %v640_v1, %v2354_v39  ;;  %v663_v10 = vrot.slane %v655_v2, %v2354_v39  ;;  %v670_v11 = vrot.slane %v656_v3, %v2354_v39  ;;  %v1182_v51 = vpop.permute.xlu0 %1181 }
 0x1f1   : > { %v1162_v13 = vpack.c.bf16 %v1154_v4, %v1154_v4  ;;  %v1163_v14 = vpack.c.bf16 %v1155_v5, %v1155_v5  ;;  %v1164_v15 = vpack.c.bf16 %v1156_v6, %v1156_v6  ;;  %v1165_v16 = vpack.c.bf16 %v1157_v7, %v1157_v7 }
 0x1f2   : > { %v1726_v19 = vcombine.low %v647_v8, %v654_v9  ;;  %v1728_v20 = vcombine.high %v647_v8, %v654_v9  ;;  %v1730_v21 = vcombine.low %v663_v10, %v670_v11  ;;  %v1732_v22 = vcombine.high %v663_v10, %v670_v11  ;;  %v1185_v9 = vpop.permute.xlu1 %1184 }
 0x1f3   : > { %1170 = vst.msk [vmem:[%s2394_s14 + $0x10] sm:$0xf] %vm855_vm2, %v1162_v13  ;;  %1171 = vst.msk [vmem:[%s2394_s14 + $0x14] sm:$0xf] %vm855_vm2, %v1163_v14  ;;  %v623_v26 = vcombine.low %v2388_v33, %v573_v61  ;;  %v624_v27 = vcombine.high %v2388_v33, %v573_v61  ;;  %v615_v34 = vrot.slane %v607_v24, %v2352_v32 }
 0x1f4   : > { %1172 = vst.msk [vmem:[%s2394_s14 + $0x18] sm:$0xf] %vm855_vm2, %v1164_v15  ;;  %1173 = vst.msk [vmem:[%s2394_s14 + $0x1c] sm:$0xf] %vm855_vm2, %v1165_v16  ;;  %v719_v28 = vrot.slane %v1726_v19, %v2352_v32  ;;  %v735_v29 = vrot.slane %v1728_v20, %v2352_v32  ;;  %v751_v30 = vrot.slane %v1730_v21, %v2352_v32  ;;  %v1188_v12 = vpop.permute.xlu0 %1187 }
 0x1f5   : > { %v767_v31 = vrot.slane %v1732_v22, %v2352_v32  ;;  %v622_v35 = vrot.slane %v608_v25, %v2352_v32  ;;  %v631_v36 = vrot.slane %v623_v26, %v2352_v32  ;;  %v638_v37 = vrot.slane %v624_v27, %v2352_v32 }
 0x1f6   : > { %v775_v38 = vcombine.low %v719_v28, %v735_v29  ;;  %v776_v40 = vcombine.high %v719_v28, %v735_v29  ;;  %v1196_v7 = vcombine.low %v2332_v18, %v1179_v50  ;;  %v1197_v8 = vcombine.high %v2332_v18, %v1179_v50 }
 0x1f7   : > { %v807_v41 = vcombine.low %v751_v30, %v767_v31  ;;  %v808_v33 = vcombine.high %v751_v30, %v767_v31  ;;  %v671_v42 = vcombine.low %v615_v34, %v631_v36  ;;  %v672_v43 = vcombine.high %v615_v34, %v631_v36 }
 0x1f8   : > { %v687_v44 = vcombine.low %v622_v35, %v638_v37  ;;  %v688_v45 = vcombine.high %v622_v35, %v638_v37  ;;  %v783_v46 = vrot.slane %v775_v38, %v2354_v39  ;;  %v790_v47 = vrot.slane %v776_v40, %v2354_v39 }
 0x1f9   : > { %v815_v48 = vrot.slane %v807_v41, %v2354_v39  ;;  %v822_v49 = vrot.slane %v808_v33, %v2354_v39  ;;  %v679_v52 = vrot.slane %v671_v42, %v2354_v39  ;;  %v686_v53 = vrot.slane %v672_v43, %v2354_v39  ;;  %v1191_v41 = vpop.permute.xlu1 %1190  ;;  %v1194_v33 = vpop.permute.xlu0 %1193 }
 0x1fa   : > { %v695_v54 = vrot.slane %v687_v44, %v2354_v39  ;;  %v702_v55 = vrot.slane %v688_v45, %v2354_v39  ;;  %v1212_v10 = vcombine.low %v2424_v23, %v1182_v51  ;;  %v1213_v11 = vcombine.high %v2424_v23, %v1182_v51 }
 0x1fb   : > { %v839_v56 = vcombine.low %v783_v46, %v815_v48  ;;  %v840_v58 = vcombine.high %v783_v46, %v815_v48  ;;  %v841_v59 = vcombine.low %v790_v47, %v822_v49  ;;  %v842_v60 = vcombine.high %v790_v47, %v822_v49 }
 0x1fc   : > { %v1727_v61 = vcombine.low %v679_v52, %v686_v53  ;;  %v1729_v57 = vcombine.high %v679_v52, %v686_v53  ;;  %v1731_v62 = vcombine.low %v695_v54, %v702_v55  ;;  %v1733_v17 = vcombine.high %v695_v54, %v702_v55 }
 0x1fd   : > { %v847_v63 = vpack.c.bf16 %v839_v56, %v839_v56  ;;  %v848_v0 = vpack.c.bf16 %v840_v58, %v840_v58  ;;  %v849_v1 = vpack.c.bf16 %v841_v59, %v841_v59  ;;  %v850_v2 = vpack.c.bf16 %v842_v60, %v842_v60 }
 0x1fe   : > { %v726_v3 = vrot.slane %v1727_v61, %v2352_v32  ;;  %v742_v4 = vrot.slane %v1729_v57, %v2352_v32  ;;  %v758_v5 = vrot.slane %v1731_v62, %v2352_v32  ;;  %v774_v6 = vrot.slane %v1733_v17, %v2352_v32 }
 0x1ff   : > { %856 = vst.msk [vmem:[%s2456_s7] sm:$0xf] %vm855_vm2, %v847_v63  ;;  %857 = vst.msk [vmem:[%s2456_s7 + $0x4] sm:$0xf] %vm855_vm2, %v848_v0  ;;  %v1204_v19 = vrot.slane %v1196_v7, %v2352_v32  ;;  %v1211_v20 = vrot.slane %v1197_v8, %v2352_v32  ;;  %v1220_v21 = vrot.slane %v1212_v10, %v2352_v32 }
 0x200   : > { %858 = vst.msk [vmem:[%s2456_s7 + $0x8] sm:$0xf] %vm855_vm2, %v849_v1  ;;  %859 = vst.msk [vmem:[%s2456_s7 + $0xc] sm:$0xf] %vm855_vm2, %v850_v2  ;;  %v791_v13 = vcombine.low %v726_v3, %v742_v4  ;;  %v792_v14 = vcombine.high %v726_v3, %v742_v4  ;;  %v823_v15 = vcombine.low %v758_v5, %v774_v6 }
 0x201   : > { %v824_v16 = vcombine.high %v758_v5, %v774_v6  ;;  %v1227_v22 = vrot.slane %v1213_v11, %v2352_v32  ;;  %v1260_v26 = vcombine.low %v1204_v19, %v1220_v21  ;;  %v1261_v27 = vcombine.high %v1204_v19, %v1220_v21 }
 0x202   : > { %v799_v18 = vrot.slane %v791_v13, %v2354_v39  ;;  %v806_v24 = vrot.slane %v792_v14, %v2354_v39  ;;  %v831_v25 = vrot.slane %v823_v15, %v2354_v39  ;;  %v1228_v50 = vcombine.low %v1185_v9, %v1191_v41 }
 0x203   : > { %v838_v23 = vrot.slane %v824_v16, %v2354_v39  ;;  %v1276_v28 = vcombine.low %v1211_v20, %v1227_v22  ;;  %v1277_v29 = vcombine.high %v1211_v20, %v1227_v22  ;;  %v1268_v36 = vrot.slane %v1260_v26, %v2354_v39 }
 0x204   : > { %v843_v30 = vcombine.low %v799_v18, %v831_v25  ;;  %v844_v31 = vcombine.high %v799_v18, %v831_v25  ;;  %v1275_v37 = vrot.slane %v1261_v27, %v2354_v39  ;;  %v1229_v51 = vcombine.high %v1185_v9, %v1191_v41 }
 0x205   : > { %v845_v34 = vcombine.low %v806_v24, %v838_v23  ;;  %v846_v35 = vcombine.high %v806_v24, %v838_v23  ;;  %v1284_v38 = vrot.slane %v1276_v28, %v2354_v39  ;;  %v1291_v40 = vrot.slane %v1277_v29, %v2354_v39 }
 0x206   : > { %v851_v42 = vpack.c.bf16 %v843_v30, %v843_v30  ;;  %v852_v43 = vpack.c.bf16 %v844_v31, %v844_v31  ;;  %v1742_v46 = vcombine.low %v1268_v36, %v1275_v37  ;;  %v1744_v47 = vcombine.high %v1268_v36, %v1275_v37 }
 0x207   : > { %v853_v44 = vpack.c.bf16 %v845_v34, %v845_v34  ;;  %v854_v45 = vpack.c.bf16 %v846_v35, %v846_v35  ;;  %v1746_v48 = vcombine.low %v1284_v38, %v1291_v40  ;;  %v1748_v49 = vcombine.high %v1284_v38, %v1291_v40 }
 0x208   : > { %860 = vst.msk [vmem:[%s2456_s7 + $0x10] sm:$0xf] %vm855_vm2, %v851_v42  ;;  %861 = vst.msk [vmem:[%s2456_s7 + $0x14] sm:$0xf] %vm855_vm2, %v852_v43  ;;  %v1244_v52 = vcombine.low %v1188_v12, %v1194_v33  ;;  %v1245_v53 = vcombine.high %v1188_v12, %v1194_v33  ;;  %v1340_v54 = vrot.slane %v1742_v46, %v2352_v32 }
 0x209   : > { %862 = vst.msk [vmem:[%s2456_s7 + $0x18] sm:$0xf] %vm855_vm2, %v853_v44  ;;  %863 = vst.msk [vmem:[%s2456_s7 + $0x1c] sm:$0xf] %vm855_vm2, %v854_v45  ;;  %v1356_v55 = vrot.slane %v1744_v47, %v2352_v32  ;;  %v1372_v56 = vrot.slane %v1746_v48, %v2352_v32  ;;  %v1388_v58 = vrot.slane %v1748_v49, %v2352_v32 }
 0x20a   : > { %v1236_v59 = vrot.slane %v1228_v50, %v2352_v32  ;;  %v1243_v60 = vrot.slane %v1229_v51, %v2352_v32  ;;  %v1252_v61 = vrot.slane %v1244_v52, %v2352_v32  ;;  %v1259_v57 = vrot.slane %v1245_v53, %v2352_v32 }
 0x20b   : > { %v1396_v62 = vcombine.low %v1340_v54, %v1356_v55  ;;  %v1397_v17 = vcombine.high %v1340_v54, %v1356_v55  ;;  %v1428_v63 = vcombine.low %v1372_v56, %v1388_v58  ;;  %v1429_v0 = vcombine.high %v1372_v56, %v1388_v58 }
 0x20c   : > { %v1292_v1 = vcombine.low %v1236_v59, %v1252_v61  ;;  %v1293_v2 = vcombine.high %v1236_v59, %v1252_v61  ;;  %v1308_v3 = vcombine.low %v1243_v60, %v1259_v57  ;;  %v1309_v4 = vcombine.high %v1243_v60, %v1259_v57 }
 0x20d   : > { %v1404_v5 = vrot.slane %v1396_v62, %v2354_v39  ;;  %v1411_v6 = vrot.slane %v1397_v17, %v2354_v39  ;;  %v1436_v7 = vrot.slane %v1428_v63, %v2354_v39  ;;  %v1443_v8 = vrot.slane %v1429_v0, %v2354_v39 }
 0x20e   : > { %v1300_v9 = vrot.slane %v1292_v1, %v2354_v39  ;;  %v1307_v10 = vrot.slane %v1293_v2, %v2354_v39  ;;  %v1316_v11 = vrot.slane %v1308_v3, %v2354_v39  ;;  %v1323_v12 = vrot.slane %v1309_v4, %v2354_v39 }
 0x20f   : > { %v1460_v13 = vcombine.low %v1404_v5, %v1436_v7  ;;  %v1461_v14 = vcombine.high %v1404_v5, %v1436_v7  ;;  %v1462_v15 = vcombine.low %v1411_v6, %v1443_v8  ;;  %v1463_v16 = vcombine.high %v1411_v6, %v1443_v8 }
 0x210   : > { %v1743_v19 = vcombine.low %v1300_v9, %v1307_v10  ;;  %v1745_v20 = vcombine.high %v1300_v9, %v1307_v10  ;;  %v1747_v21 = vcombine.low %v1316_v11, %v1323_v12  ;;  %v1749_v22 = vcombine.high %v1316_v11, %v1323_v12 }
 0x211   : > { %v1468_v18 = vpack.c.bf16 %v1460_v13, %v1460_v13  ;;  %v1469_v24 = vpack.c.bf16 %v1461_v14, %v1461_v14  ;;  %v1470_v25 = vpack.c.bf16 %v1462_v15, %v1462_v15  ;;  %v1471_v23 = vpack.c.bf16 %v1463_v16, %v1463_v16 }
 0x212   : > { %v1347_v26 = vrot.slane %v1743_v19, %v2352_v32  ;;  %v1363_v27 = vrot.slane %v1745_v20, %v2352_v32  ;;  %v1379_v28 = vrot.slane %v1747_v21, %v2352_v32  ;;  %v1395_v29 = vrot.slane %v1749_v22, %v2352_v32 }
 0x213   : > { %1476 = vst.msk [vmem:[%s2514_s9] sm:$0xf] %vm855_vm2, %v1468_v18  ;;  %1477 = vst.msk [vmem:[%s2514_s9 + $0x4] sm:$0xf] %vm855_vm2, %v1469_v24 }
 0x214   : > { %1478 = vst.msk [vmem:[%s2514_s9 + $0x8] sm:$0xf] %vm855_vm2, %v1470_v25  ;;  %1479 = vst.msk [vmem:[%s2514_s9 + $0xc] sm:$0xf] %vm855_vm2, %v1471_v23  ;;  %v1412_v30 = vcombine.low %v1347_v26, %v1363_v27  ;;  %v1413_v31 = vcombine.high %v1347_v26, %v1363_v27  ;;  %v1444_v34 = vcombine.low %v1379_v28, %v1395_v29 }
 0x215   : > { %v1445_v35 = vcombine.high %v1379_v28, %v1395_v29 }
 0x216   : > { %v1420_v36 = vrot.slane %v1412_v30, %v2354_v39  ;;  %v1427_v32 = vrot.slane %v1413_v31, %v2354_v39  ;;  %v1452_v37 = vrot.slane %v1444_v34, %v2354_v39 }
 0x217   : > { %v1459_v38 = vrot.slane %v1445_v35, %v2354_v39 }
 0x218   : > { %v1464_v40 = vcombine.low %v1420_v36, %v1452_v37  ;;  %v1465_v41 = vcombine.high %v1420_v36, %v1452_v37 }
 0x219   : > { %v1466_v33 = vcombine.low %v1427_v32, %v1459_v38  ;;  %v1467_v42 = vcombine.high %v1427_v32, %v1459_v38 }
 0x21a   : > { %v1472_v43 = vpack.c.bf16 %v1464_v40, %v1464_v40  ;;  %v1473_v44 = vpack.c.bf16 %v1465_v41, %v1465_v41 }
 0x21b   : > { %v1474_v45 = vpack.c.bf16 %v1466_v33, %v1466_v33  ;;  %v1475_v46 = vpack.c.bf16 %v1467_v42, %v1467_v42 }
 0x21c   : > { %1480 = vst.msk [vmem:[%s2514_s9 + $0x10] sm:$0xf] %vm855_vm2, %v1472_v43  ;;  %1481 = vst.msk [vmem:[%s2514_s9 + $0x14] sm:$0xf] %vm855_vm2, %v1473_v44 }
 0x21d   : > { %1482 = vst.msk [vmem:[%s2514_s9 + $0x18] sm:$0xf] %vm855_vm2, %v1474_v45  ;;  %1483 = vst.msk [vmem:[%s2514_s9 + $0x1c] sm:$0xf] %vm855_vm2, %v1475_v46 }
 0x21e PF: > { %s22_s26 = sadd.s32 1, %s2065_s26   ;;  %s2578_s15 = smov %s2272_s21 }
 0x21f   : > { %p19_p4 = scmp.ge.s32.totalorder %s22_s26, 4   ;;  %s2579_s21 = smov %s2049_s22 }
 0x220   : > { %s2580_s22 = smov %s2053_s23  ;;  %s2581_s23 = smov %s2578_s15 }
 0x221   : > { %s2582_s24 = smov %s2061_s25  ;;  %s2583_s25 = smov %s2585_s19 }
 0x222   :  { %21 = sbr.rel (!%p19_p4) target bundleno = 6 (0x6), region = 112 }
 0x229   :  { %1555 = vsyncpa [#allocation3], 1 }
 0x22a   :  { %1557 = vsyncpa [#allocation3 + $0x1], 1 }
 0x22b   :  { %1558 = vsyncpa [#allocation5], 1 }
 0x22c   :  { %1559 = vsyncpa [#allocation8], 1 }

</bundles_post_ra>
